<compile_context>
chip_gen: v5e
topology: v5e:2x2
jax: 0.10.0
libtpu: 0.0.40
codegen_flags: <defaults>
</compile_context>

<pallas_src>
import functools

import numpy as np
import jax
import jax.numpy as jnp
from jax import lax
from jax.experimental import pallas as pl
from jax.experimental.pallas import tpu as pltpu

# ---------------- configuration (small shapes implied by the module) ----------
EMB_DIM = 32                    # args.embedding_dim
EMB_D1 = 4                      # args.embedding_shape1
EMB_D2 = EMB_DIM // EMB_D1      # 8
H_IN = 3 * EMB_D1               # 12   (ent / rel / time stacked along height)
W_IN = EMB_D2                   # 8
KH = KW = 3
OH = H_IN - KH + 1              # 10
OW = W_IN - KW + 1              # 6
C_OUT = 32                      # conv1 output channels
HIDDEN = C_OUT * OH * OW        # args.hidden_size = 1920
IN_FLAT = H_IN * W_IN           # 96 == 3 * EMB_DIM
OUTPUT_DIM = 128                # num_entities for TConvE (== output_dim)
NUM_RELS = 8
BATCH = 8
BN_EPS = 1e-5
MAX_TB = 256                    # rows per grid step (>= v6e/v7x MXU height)


# ----------------------------- fused Pallas kernel -----------------------------
def fused_kernel(e1_ref, rel_ref, t_ref, copy_ref,
                 wce_ref, wcr_ref, wct_ref, bc_ref,
                 wfc_ref, bfc_ref, ewT_ref, eb_ref, out_ref):
    bf16 = jnp.bfloat16
    f32 = jnp.float32
    # conv1 (bn0 + bn1 folded, expressed as a Toeplitz matmul) -- three weight row
    # slabs so the ent/rel/time concat never has to materialize -- then relu.
    feat = (jnp.dot(e1_ref[...].astype(bf16), wce_ref[...], preferred_element_type=f32)
            + jnp.dot(rel_ref[0].astype(bf16), wcr_ref[...], preferred_element_type=f32)
            + jnp.dot(t_ref[...].astype(bf16), wct_ref[...], preferred_element_type=f32)
            + bc_ref[...])                                            # (TB, HIDDEN)
    feat = jnp.maximum(feat, 0.0)
    # fc (+ bias, bn2 folded): lane-dense (EMB_DIM, HIDDEN) weight, contract HIDDEN.
    h = lax.dot_general(feat.astype(bf16), wfc_ref[...],
                        dimension_numbers=(((1,), (1,)), ((), ())),
                        preferred_element_type=f32) + bfc_ref[...]    # (TB, EMB_DIM)
    h = jnp.maximum(h, 0.0)
    # x @ emb_e.T + b -> sigmoid (exact reciprocal -- matches reference closely).
    logits = jnp.dot(h.astype(bf16), ewT_ref[...],
                     preferred_element_type=f32) + eb_ref[...]        # (TB, OUT)
    pred = 1.0 / (1.0 + jnp.exp(-logits))
    # encoded_mask: +1 where copy_vocabulary != 0, -50 where == 0 (native dtype cmp).
    mask = jnp.where(copy_ref[...] != 0, jnp.float32(1.0), jnp.float32(-50.0))
    # softmax(dim=1): pred in (0,1), mask in {1,-50} => s <= 2, no max-shift needed.
    e = jnp.exp(pred + mask)
    out_ref[...] = e / jnp.sum(e, axis=1, keepdims=True)


# --------------------------- parameters (deterministic) ------------------------
def _toeplitz_conv_weight(conv_w):
    """conv_w: (C_OUT, KH, KW) numpy -> (IN_FLAT, HIDDEN) Toeplitz matrix whose
    columns follow PyTorch's x.view(B, -1) channel-major (c, oh, ow) order."""
    W = np.zeros((IN_FLAT, HIDDEN), np.float32)
    for c in range(C_OUT):
        for oh in range(OH):
            for ow in range(OW):
                col = c * (OH * OW) + oh * OW + ow
                for kh in range(KH):
                    for kw in range(KW):
                        W[(oh + kh) * W_IN + (ow + kw), col] = conv_w[c, kh, kw]
    return W


def init_params(key):
    ks = jax.random.split(key, 4)
    # TConvE.emb_e : xavier_normal_, padding_idx=0 row zeroed.
    std_e = (2.0 / (OUTPUT_DIM + EMB_DIM)) ** 0.5
    emb_e = jax.random.normal(ks[0], (OUTPUT_DIM, EMB_DIM), jnp.float32) * std_e
    emb_e = emb_e.at[0].set(0.0)
    # conv1: Conv2d(1, 32, 3, bias=False)  (args.use_bias = False)
    conv_w = jax.random.normal(ks[1], (C_OUT, KH, KW), jnp.float32) * 0.2
    # fc: Linear(hidden_size, embedding_dim)
    fc_w = jax.random.normal(ks[2], (EMB_DIM, HIDDEN), jnp.float32) * (1.0 / HIDDEN) ** 0.5
    fc_b = jax.random.normal(ks[3], (EMB_DIM,), jnp.float32) * 0.01
    # entity bias b (registered parameter, zeros)
    b_ent = jnp.zeros((OUTPUT_DIM,), jnp.float32)

    # BatchNorm eval-mode affine fold.
    # TODO(synk): if trained running stats are loaded, re-run this fold with them.
    def bn_fold(gamma, beta, mean, var):
        scale = gamma / jnp.sqrt(var + BN_EPS)
        return scale, beta - mean * scale

    bn0_s, bn0_b = bn_fold(jnp.ones(()), jnp.zeros(()), jnp.zeros(()), jnp.ones(()))
    bn1_s, bn1_b = bn_fold(jnp.ones((C_OUT,)), jnp.zeros((C_OUT,)),
                           jnp.zeros((C_OUT,)), jnp.ones((C_OUT,)))
    bn2_s, bn2_b = bn_fold(jnp.ones((EMB_DIM,)), jnp.zeros((EMB_DIM,)),
                           jnp.zeros((EMB_DIM,)), jnp.ones((EMB_DIM,)))

    # conv as Toeplitz matmul with bn0 (scalar) and bn1 (per-channel) folded in:
    #   conv(bn0_s*x + bn0_b)[c] = bn0_s*conv(x)[c] + bn0_b*sum(w[c]); then *bn1_s[c]+bn1_b[c]
    w_toep = jnp.asarray(_toeplitz_conv_weight(np.asarray(conv_w)))      # (96, 1920)
    ch_scale = jnp.repeat(bn1_s, OH * OW)                                # (HIDDEN,)
    ch_shift = jnp.repeat(bn1_b, OH * OW)                                # (HIDDEN,)
    w_sum = jnp.repeat(jnp.sum(conv_w, axis=(1, 2)), OH * OW)            # (HIDDEN,)
    w_conv = (w_toep * (bn0_s * ch_scale)[None, :]).astype(jnp.bfloat16)  # bf16 weights
    b_conv = (ch_scale * bn0_b * w_sum + ch_shift).reshape(1, HIDDEN)    # f32 bias

    # fc with bn2 folded; kept lane-dense as (EMB_DIM, HIDDEN) -- no transpose.
    w_fc = (fc_w * bn2_s[:, None]).astype(jnp.bfloat16)                  # (32, 1920)
    b_fc = (fc_b * bn2_s + bn2_b).reshape(1, EMB_DIM)

    # Row-slab split of the Toeplitz weight: rows 0:32 -> ent, 32:64 -> rel, 64:96 -> time.
    return dict(wce=w_conv[:EMB_DIM],
                wcr=w_conv[EMB_DIM:2 * EMB_DIM],
                wct=w_conv[2 * EMB_DIM:],
                b_conv=b_conv, w_fc=w_fc, b_fc=b_fc,
                ewT=emb_e.T.astype(jnp.bfloat16),                        # (32, 128) lane-dense
                eb=b_ent.reshape(1, OUTPUT_DIM))


# ------------------------------ forward (jit + single kernel) ------------------
@functools.partial(jax.jit, static_argnames=("entity",))
def global_history_forward(params, s_embed, rel_embed, o_embed, time_embed,
                           copy_vocabulary, entity="object"):
    if entity == "object":
        e1, rel_idx = s_embed, 0
    elif entity == "subject":
        e1, rel_idx = o_embed, 1
    else:
        raise ValueError(entity)

    # Batch tiling: pad rows to a multiple of 8, tile at up to MAX_TB rows per grid
    # step; the batch grid axis is "parallel" (megacore / v7x second TC).
    b = e1.shape[0]
    b_pad = ((b + 7) // 8) * 8
    tb = min(b_pad, MAX_TB)
    if b_pad % tb:
        b_pad = ((b_pad + tb - 1) // tb) * tb
    if b_pad != b:
        pad = ((0, b_pad - b), (0, 0))
        e1 = jnp.pad(e1, pad)
        time_embed = jnp.pad(time_embed, pad)
        rel_embed = jnp.pad(rel_embed, ((0, 0),) + pad)
        copy_vocabulary = jnp.pad(copy_vocabulary, pad)
    n_blocks = b_pad // tb

    row_spec = pl.BlockSpec((tb, EMB_DIM), lambda i: (i, 0))
    rel_spec = pl.BlockSpec((1, tb, EMB_DIM), lambda i: (rel_idx, i, 0))  # static rel select
    copy_spec = pl.BlockSpec((tb, OUTPUT_DIM), lambda i: (i, 0))
    out_spec = pl.BlockSpec((tb, OUTPUT_DIM), lambda i: (i, 0))

    def resident(shape):  # whole-weight block, VMEM-resident across all grid steps
        return pl.BlockSpec(shape, lambda i: (0, 0))

    flops = 2 * b_pad * (3 * EMB_DIM * HIDDEN + HIDDEN * EMB_DIM + EMB_DIM * OUTPUT_DIM)
    weight_bytes = ((3 * EMB_DIM * HIDDEN + EMB_DIM * HIDDEN + EMB_DIM * OUTPUT_DIM) * 2
                    + (HIDDEN + EMB_DIM + OUTPUT_DIM) * 4)
    act_bytes = b_pad * (3 * EMB_DIM + OUTPUT_DIM) * 4 + b_pad * OUTPUT_DIM * 4
    cost = pl.CostEstimate(flops=int(flops),
                           transcendentals=int(2 * b_pad * OUTPUT_DIM),
                           bytes_accessed=int(weight_bytes + act_bytes))

    out = pl.pallas_call(
        fused_kernel,
        grid=(n_blocks,),
        in_specs=[row_spec, rel_spec, row_spec, copy_spec,
                  resident((EMB_DIM, HIDDEN)), resident((EMB_DIM, HIDDEN)),
                  resident((EMB_DIM, HIDDEN)), resident((1, HIDDEN)),
                  resident((EMB_DIM, HIDDEN)), resident((1, EMB_DIM)),
                  resident((EMB_DIM, OUTPUT_DIM)), resident((1, OUTPUT_DIM))],
        out_specs=out_spec,
        out_shape=jax.ShapeDtypeStruct((b_pad, OUTPUT_DIM), jnp.float32),
        compiler_params=pltpu.CompilerParams(dimension_semantics=("parallel",)),
        cost_estimate=cost,
    )(e1, rel_embed, time_embed, copy_vocabulary,
      params["wce"], params["wcr"], params["wct"], params["b_conv"],
      params["w_fc"], params["b_fc"], params["ewT"], params["eb"])

    return out[:b] if b_pad != b else out


# ------------------------------------ main --------------------------------------
if __name__ == "__main__":
    key = jax.random.PRNGKey(0)
    kp, k1, k2, k3, k4, k5 = jax.random.split(key, 6)

    params = init_params(kp)

    s_embed = jax.random.normal(k1, (BATCH, EMB_DIM), jnp.float32)
    o_embed = jax.random.normal(k2, (BATCH, EMB_DIM), jnp.float32)
    rel_embed = jax.random.normal(k3, (2, BATCH, EMB_DIM), jnp.float32)
    time_embed = jax.random.normal(k4, (BATCH, EMB_DIM), jnp.float32)
    # copy_vocabulary: non-negative counts with plenty of exact zeros
    raw = jax.random.uniform(k5, (BATCH, OUTPUT_DIM), jnp.float32)
    copy_vocabulary = jnp.where(raw > 0.6, jnp.ceil(raw * 5.0), 0.0)

    out = global_history_forward(params, s_embed, rel_embed, o_embed,
                                 time_embed, copy_vocabulary, entity="object")
    out = jax.block_until_ready(out)

    assert out.shape == (BATCH, OUTPUT_DIM)
    assert bool(jnp.all(jnp.isfinite(out)))
    row_sums = jnp.sum(out, axis=1)
    assert bool(jnp.all(jnp.abs(row_sums - 1.0) < 1e-3))
    print("KERNEL_OK")
</pallas_src>

<mosaic_0001>
module attributes {stable_mosaic.version = 11 : i64} {
  func.func @fused_kernel(%arg0: i32, %arg1: memref<8x32xf32, #tpu.memory_space<vmem>>, %arg2: memref<1x8x32xf32, #tpu.memory_space<vmem>>, %arg3: memref<8x32xf32, #tpu.memory_space<vmem>>, %arg4: memref<8x128xf32, #tpu.memory_space<vmem>>, %arg5: memref<32x1920xbf16, #tpu.memory_space<vmem>>, %arg6: memref<32x1920xbf16, #tpu.memory_space<vmem>>, %arg7: memref<32x1920xbf16, #tpu.memory_space<vmem>>, %arg8: memref<1x1920xf32, #tpu.memory_space<vmem>>, %arg9: memref<32x1920xbf16, #tpu.memory_space<vmem>>, %arg10: memref<1x32xf32, #tpu.memory_space<vmem>>, %arg11: memref<32x128xbf16, #tpu.memory_space<vmem>>, %arg12: memref<1x128xf32, #tpu.memory_space<vmem>>, %arg13: memref<8x128xf32, #tpu.memory_space<vmem>>) attributes {dimension_semantics = [#tpu.dimension_semantics<parallel>], iteration_bounds = array<i64: 1>, scalar_prefetch = 0 : i64, scratch_operands = 0 : i64, tpu.core_type = #tpu.core_type<tc>, window_params = [{transform_indices = @transform_0, window_bounds = array<i64: 8, 32>}, {transform_indices = @transform_1, window_bounds = array<i64: 1, 8, 32>}, {transform_indices = @transform_2, window_bounds = array<i64: 8, 32>}, {transform_indices = @transform_3, window_bounds = array<i64: 8, 128>}, {pipeline_mode = #tpu.pipeline_mode<synchronous>, transform_indices = @transform_4, window_bounds = array<i64: 32, 1920>}, {pipeline_mode = #tpu.pipeline_mode<synchronous>, transform_indices = @transform_5, window_bounds = array<i64: 32, 1920>}, {pipeline_mode = #tpu.pipeline_mode<synchronous>, transform_indices = @transform_6, window_bounds = array<i64: 32, 1920>}, {pipeline_mode = #tpu.pipeline_mode<synchronous>, transform_indices = @transform_7, window_bounds = array<i64: 1, 1920>}, {pipeline_mode = #tpu.pipeline_mode<synchronous>, transform_indices = @transform_8, window_bounds = array<i64: 32, 1920>}, {pipeline_mode = #tpu.pipeline_mode<synchronous>, transform_indices = @transform_9, window_bounds = array<i64: 1, 32>}, {pipeline_mode = #tpu.pipeline_mode<synchronous>, transform_indices = @transform_10, window_bounds = array<i64: 32, 128>}, {pipeline_mode = #tpu.pipeline_mode<synchronous>, transform_indices = @transform_11, window_bounds = array<i64: 1, 128>}, {transform_indices = @transform_12, window_bounds = array<i64: 8, 128>}]} {
    %c0 = arith.constant 0 : index
    %c0_0 = arith.constant 0 : index
    %0 = vector.load %arg1[%c0, %c0_0] : memref<8x32xf32, #tpu.memory_space<vmem>>, vector<8x32xf32>
    %1 = arith.truncf %0 : vector<8x32xf32> to vector<8x32xbf16>
    %c0_1 = arith.constant 0 : index
    %c0_2 = arith.constant 0 : index
    %2 = vector.load %arg5[%c0_1, %c0_2] : memref<32x1920xbf16, #tpu.memory_space<vmem>>, vector<32x1920xbf16>
    %cst = arith.constant dense<0.000000e+00> : vector<8x1920xf32>
    %3 = tpu.matmul %1, %2, %cst {dimension_numbers = #tpu.dot_dimension_numbers<[1], [0], [0], [1], [0, 0, 1, 1], [], []>} : vector<8x32xbf16>, vector<32x1920xbf16>, vector<8x1920xf32> -> vector<8x1920xf32>
    %c0_3 = arith.constant 0 : index
    %c0_4 = arith.constant 0 : index
    %c0_5 = arith.constant 0 : index
    %4 = vector.load %arg2[%c0_3, %c0_4, %c0_5] : memref<1x8x32xf32, #tpu.memory_space<vmem>>, vector<1x8x32xf32>
    %5 = vector.shape_cast %4 : vector<1x8x32xf32> to vector<8x32xf32>
    %6 = arith.truncf %5 : vector<8x32xf32> to vector<8x32xbf16>
    %c0_6 = arith.constant 0 : index
    %c0_7 = arith.constant 0 : index
    %7 = vector.load %arg6[%c0_6, %c0_7] : memref<32x1920xbf16, #tpu.memory_space<vmem>>, vector<32x1920xbf16>
    %cst_8 = arith.constant dense<0.000000e+00> : vector<8x1920xf32>
    %8 = tpu.matmul %6, %7, %cst_8 {dimension_numbers = #tpu.dot_dimension_numbers<[1], [0], [0], [1], [0, 0, 1, 1], [], []>} : vector<8x32xbf16>, vector<32x1920xbf16>, vector<8x1920xf32> -> vector<8x1920xf32>
    %9 = arith.addf %3, %8 : vector<8x1920xf32>
    %c0_9 = arith.constant 0 : index
    %c0_10 = arith.constant 0 : index
    %10 = vector.load %arg3[%c0_9, %c0_10] : memref<8x32xf32, #tpu.memory_space<vmem>>, vector<8x32xf32>
    %11 = arith.truncf %10 : vector<8x32xf32> to vector<8x32xbf16>
    %c0_11 = arith.constant 0 : index
    %c0_12 = arith.constant 0 : index
    %12 = vector.load %arg7[%c0_11, %c0_12] : memref<32x1920xbf16, #tpu.memory_space<vmem>>, vector<32x1920xbf16>
    %cst_13 = arith.constant dense<0.000000e+00> : vector<8x1920xf32>
    %13 = tpu.matmul %11, %12, %cst_13 {dimension_numbers = #tpu.dot_dimension_numbers<[1], [0], [0], [1], [0, 0, 1, 1], [], []>} : vector<8x32xbf16>, vector<32x1920xbf16>, vector<8x1920xf32> -> vector<8x1920xf32>
    %14 = arith.addf %9, %13 : vector<8x1920xf32>
    %c0_14 = arith.constant 0 : index
    %c0_15 = arith.constant 0 : index
    %15 = vector.load %arg8[%c0_14, %c0_15] : memref<1x1920xf32, #tpu.memory_space<vmem>>, vector<1x1920xf32>
    %16 = vector.broadcast %15 : vector<1x1920xf32> to vector<8x1920xf32>
    %17 = arith.addf %14, %16 : vector<8x1920xf32>
    %cst_16 = arith.constant 0.000000e+00 : f32
    %18 = vector.broadcast %cst_16 : f32 to vector<8x1920xf32>
    %19 = arith.maximumf %17, %18 : vector<8x1920xf32>
    %20 = arith.truncf %19 : vector<8x1920xf32> to vector<8x1920xbf16>
    %c0_17 = arith.constant 0 : index
    %c0_18 = arith.constant 0 : index
    %21 = vector.load %arg9[%c0_17, %c0_18] : memref<32x1920xbf16, #tpu.memory_space<vmem>>, vector<32x1920xbf16>
    %cst_19 = arith.constant dense<0.000000e+00> : vector<8x32xf32>
    %22 = tpu.matmul %20, %21, %cst_19 {dimension_numbers = #tpu.dot_dimension_numbers<[1], [1], [0], [0], [0, 0, 1, 0], [], []>} : vector<8x1920xbf16>, vector<32x1920xbf16>, vector<8x32xf32> -> vector<8x32xf32>
    %c0_20 = arith.constant 0 : index
    %c0_21 = arith.constant 0 : index
    %23 = vector.load %arg10[%c0_20, %c0_21] : memref<1x32xf32, #tpu.memory_space<vmem>>, vector<1x32xf32>
    %24 = vector.broadcast %23 : vector<1x32xf32> to vector<8x32xf32>
    %25 = arith.addf %22, %24 : vector<8x32xf32>
    %cst_22 = arith.constant 0.000000e+00 : f32
    %26 = vector.broadcast %cst_22 : f32 to vector<8x32xf32>
    %27 = arith.maximumf %25, %26 : vector<8x32xf32>
    %28 = arith.truncf %27 : vector<8x32xf32> to vector<8x32xbf16>
    %c0_23 = arith.constant 0 : index
    %c0_24 = arith.constant 0 : index
    %29 = vector.load %arg11[%c0_23, %c0_24] : memref<32x128xbf16, #tpu.memory_space<vmem>>, vector<32x128xbf16>
    %cst_25 = arith.constant dense<0.000000e+00> : vector<8x128xf32>
    %30 = tpu.matmul %28, %29, %cst_25 {dimension_numbers = #tpu.dot_dimension_numbers<[1], [0], [0], [1], [0, 0, 1, 1], [], []>} : vector<8x32xbf16>, vector<32x128xbf16>, vector<8x128xf32> -> vector<8x128xf32>
    %c0_26 = arith.constant 0 : index
    %c0_27 = arith.constant 0 : index
    %31 = vector.load %arg12[%c0_26, %c0_27] : memref<1x128xf32, #tpu.memory_space<vmem>>, vector<1x128xf32>
    %32 = vector.broadcast %31 : vector<1x128xf32> to vector<8x128xf32>
    %33 = arith.addf %30, %32 : vector<8x128xf32>
    %cst_28 = arith.constant 0.000000e+00 : f32
    %34 = vector.broadcast %cst_28 : f32 to vector<8x128xf32>
    %35 = arith.subf %34, %33 : vector<8x128xf32>
    %36 = math.exp %35 : vector<8x128xf32>
    %cst_29 = arith.constant 1.000000e+00 : f32
    %37 = vector.broadcast %cst_29 : f32 to vector<8x128xf32>
    %38 = arith.addf %37, %36 : vector<8x128xf32>
    %cst_30 = arith.constant 1.000000e+00 : f32
    %39 = vector.broadcast %cst_30 : f32 to vector<8x128xf32>
    %40 = arith.divf %39, %38 : vector<8x128xf32>
    %c0_31 = arith.constant 0 : index
    %c0_32 = arith.constant 0 : index
    %41 = vector.load %arg4[%c0_31, %c0_32] : memref<8x128xf32, #tpu.memory_space<vmem>>, vector<8x128xf32>
    %cst_33 = arith.constant 0.000000e+00 : f32
    %42 = vector.broadcast %cst_33 : f32 to vector<8x128xf32>
    %43 = arith.cmpf one, %41, %42 : vector<8x128xf32>
    %cst_34 = arith.constant 1.000000e+00 : f32
    %cst_35 = arith.constant -5.000000e+01 : f32
    %44 = vector.broadcast %cst_34 : f32 to vector<8x128xf32>
    %45 = vector.broadcast %cst_35 : f32 to vector<8x128xf32>
    %46 = arith.select %43, %44, %45 : vector<8x128xi1>, vector<8x128xf32>
    %47 = arith.addf %40, %46 : vector<8x128xf32>
    %48 = math.exp %47 : vector<8x128xf32>
    %cst_36 = arith.constant dense<0.000000e+00> : vector<8xf32>
    %49 = vector.multi_reduction <add>, %48, %cst_36 [1] : vector<8x128xf32> to vector<8xf32>
    %50 = vector.shape_cast %49 : vector<8xf32> to vector<8x1xf32>
    %51 = vector.broadcast %50 : vector<8x1xf32> to vector<8x128xf32>
    %52 = arith.divf %48, %51 : vector<8x128xf32>
    %c0_37 = arith.constant 0 : index
    %c0_38 = arith.constant 0 : index
    %53 = vector.load %arg13[%c0_37, %c0_38] : memref<8x128xf32, #tpu.memory_space<vmem>>, vector<8x128xf32>
    tpu.vector_store %arg13[%c0_37, %c0_38], %52 {strides = array<i32>} : memref<8x128xf32, #tpu.memory_space<vmem>>, vector<8x128xf32>,
    return
  }
  func.func @transform_0(%arg0: i32) -> (i32, i32) {
    %c0_i32 = arith.constant 0 : i32
    %c0_i32_0 = arith.constant 0 : i32
    return %arg0, %c0_i32 : i32, i32
  }
  func.func @transform_1(%arg0: i32) -> (i32, i32, i32) {
    %c0_i32 = arith.constant 0 : i32
    %c0_i32_0 = arith.constant 0 : i32
    %c0_i32_1 = arith.constant 0 : i32
    return %c0_i32, %arg0, %c0_i32_0 : i32, i32, i32
  }
  func.func @transform_2(%arg0: i32) -> (i32, i32) {
    %c0_i32 = arith.constant 0 : i32
    %c0_i32_0 = arith.constant 0 : i32
    return %arg0, %c0_i32 : i32, i32
  }
  func.func @transform_3(%arg0: i32) -> (i32, i32) {
    %c0_i32 = arith.constant 0 : i32
    %c0_i32_0 = arith.constant 0 : i32
    return %arg0, %c0_i32 : i32, i32
  }
  func.func @transform_4(%arg0: i32) -> (i32, i32) {
    %c0_i32 = arith.constant 0 : i32
    %c0_i32_0 = arith.constant 0 : i32
    %c0_i32_1 = arith.constant 0 : i32
    return %c0_i32, %c0_i32_0 : i32, i32
  }
  func.func @transform_5(%arg0: i32) -> (i32, i32) {
    %c0_i32 = arith.constant 0 : i32
    %c0_i32_0 = arith.constant 0 : i32
    %c0_i32_1 = arith.constant 0 : i32
    return %c0_i32, %c0_i32_0 : i32, i32
  }
  func.func @transform_6(%arg0: i32) -> (i32, i32) {
    %c0_i32 = arith.constant 0 : i32
    %c0_i32_0 = arith.constant 0 : i32
    %c0_i32_1 = arith.constant 0 : i32
    return %c0_i32, %c0_i32_0 : i32, i32
  }
  func.func @transform_7(%arg0: i32) -> (i32, i32) {
    %c0_i32 = arith.constant 0 : i32
    %c0_i32_0 = arith.constant 0 : i32
    %c0_i32_1 = arith.constant 0 : i32
    return %c0_i32, %c0_i32_0 : i32, i32
  }
  func.func @transform_8(%arg0: i32) -> (i32, i32) {
    %c0_i32 = arith.constant 0 : i32
    %c0_i32_0 = arith.constant 0 : i32
    %c0_i32_1 = arith.constant 0 : i32
    return %c0_i32, %c0_i32_0 : i32, i32
  }
  func.func @transform_9(%arg0: i32) -> (i32, i32) {
    %c0_i32 = arith.constant 0 : i32
    %c0_i32_0 = arith.constant 0 : i32
    %c0_i32_1 = arith.constant 0 : i32
    return %c0_i32, %c0_i32_0 : i32, i32
  }
  func.func @transform_10(%arg0: i32) -> (i32, i32) {
    %c0_i32 = arith.constant 0 : i32
    %c0_i32_0 = arith.constant 0 : i32
    %c0_i32_1 = arith.constant 0 : i32
    return %c0_i32, %c0_i32_0 : i32, i32
  }
  func.func @transform_11(%arg0: i32) -> (i32, i32) {
    %c0_i32 = arith.constant 0 : i32
    %c0_i32_0 = arith.constant 0 : i32
    %c0_i32_1 = arith.constant 0 : i32
    return %c0_i32, %c0_i32_0 : i32, i32
  }
  func.func @transform_12(%arg0: i32) -> (i32, i32) {
    %c0_i32 = arith.constant 0 : i32
    %c0_i32_0 = arith.constant 0 : i32
    return %arg0, %c0_i32 : i32, i32
  }
}

</mosaic_0001>

<bundles_post_ra>
// kernel: global_history_forward.1
= control target key start
LH: loop header
LB: loop body
LE: loop exit
PB: predicated region body
PF: predicated region fallthrough
CT: control target
= control target key end

     0   :  { %17 = vsyncpa [#allocation3], 0  ;;  %s3220_s0 = inlined_call_operand.hbm [shape: f32[8,32], index: 0, kind: input, shape index: {}]   ;;  %s3221_s1 = inlined_call_operand.hbm [shape: f32[2,8,32], index: 1, kind: input, shape index: {}]   ;;  %s3222_s2 = inlined_call_operand.vmem [shape: f32[8,32], index: 2, kind: input, shape index: {}]   ;;  %s3223_s3 = inlined_call_operand.hbm [shape: f32[8,128], index: 3, kind: input, shape index: {}]   ;;  %s3224_s4 = inlined_call_operand.hbm [shape: bf16[32,1920], index: 4, kind: input, shape index: {}]   ;;  %s3225_s5 = inlined_call_operand.hbm [shape: bf16[32,1920], index: 5, kind: input, shape index: {}]   ;;  %s3226_s6 = inlined_call_operand.hbm [shape: bf16[32,1920], index: 6, kind: input, shape index: {}]   ;;  %s3227_s7 = inlined_call_operand.hbm [shape: f32[1,1920], index: 7, kind: input, shape index: {}]   ;;  %s3228_s8 = inlined_call_operand.hbm [shape: bf16[32,1920], index: 8, kind: input, shape index: {}]   ;;  %s3229_s9 = inlined_call_operand.hbm [shape: f32[1,32], index: 9, kind: input, shape index: {}]   ;;  %s3230_s10 = inlined_call_operand.hbm [shape: bf16[32,128], index: 10, kind: input, shape index: {}]   ;;  %s3231_s11 = inlined_call_operand.vmem [shape: f32[1,128], index: 11, kind: input, shape index: {}]   ;;  %s3232_s12 = inlined_call_operand.hbm [shape: f32[8,128], index: 12, kind: output, shape index: {}]  }
   0x1   :  { %18 = vsyncpa [#allocation6], 0 }
   0x2   :  { %19 = vsyncpa [#allocation9], 0 }
   0x3   :  { %20 = vsyncpa [#allocation12], 0 }
   0x4   :  { %21 = vsyncpa [#allocation15], 0 }
   0x5   :  { %22 = vsyncpa [#allocation18], 0  ;;  %s40_s23 = sshll.u32 %s3221_s1, 4  ;;  %s41_s23 = int_to_ptr.hbm [resolvable:$true] %s40_s23 }
   0x6   :  { %23 = vsyncpa [#allocation4], 0  ;;  %s2882_s24 = smov [#allocation5]   ;;  %s63_s28 = sshll.u32 %s3224_s4, 4  ;;  %s64_s28 = int_to_ptr.hbm [resolvable:$true] %s63_s28 }
   0x7   :  { %s42_s25 = sshll.u32 %s2882_s24, 4  ;;  %s2883_s29 = smov [#allocation8]   ;;  %s43_s25 = int_to_ptr.vmem [resolvable:$true] %s42_s25 }
   0x8   :  { %45 = dma.hbm_to_vmem [thread:$0]  %s41_s23, 128, %s43_s25, [#allocation6]  }
   0x9   :  { %s65_s30 = sshll.u32 %s2883_s29, 4  ;;  %s2884_s13 = smov 960   ;;  %s66_s30 = int_to_ptr.vmem [resolvable:$true] %s65_s30 }
   0xa   :  { %s2885_s14 = smov 60   ;;  %s89_s16 = sshll.u32 %s3226_s6, 4  ;;  %s90_s16 = int_to_ptr.hbm [resolvable:$true] %s89_s16 }
   0xb   :  { %71 = dma.hbm_to_vmem [thread:$0]  %s64_s28, 3840, %s66_s30, [#allocation9], %s2884_s13, %s2884_s13, %s2885_s14  }
   0xc   :  { %s2886_s17 = smov [#allocation11]   ;;  %s113_s20 = sshll.u32 %s3228_s8, 4  ;;  %s114_s20 = int_to_ptr.hbm [resolvable:$true] %s113_s20 }
   0xd   :  { %s91_s18 = sshll.u32 %s2886_s17, 4  ;;  %s2887_s21 = smov [#allocation14]   ;;  %s92_s18 = int_to_ptr.vmem [resolvable:$true] %s91_s18 }
   0xe   :  { %97 = dma.hbm_to_vmem [thread:$0]  %s90_s16, 3840, %s92_s18, [#allocation12], %s2884_s13, %s2884_s13, %s2885_s14  }
   0xf   :  { %s115_s22 = sshll.u32 %s2887_s21, 4  ;;  %s29_s25 = sshll.u32 %s3220_s0, 4  ;;  %s116_s22 = int_to_ptr.vmem [resolvable:$true] %s115_s22  ;;  %s30_s25 = int_to_ptr.hbm [resolvable:$true] %s29_s25 }
  0x10   :  { %121 = dma.hbm_to_vmem [thread:$0]  %s114_s20, 3840, %s116_s22, [#allocation15], %s2884_s13, %s2884_s13, %s2885_s14  }
  0x11   :  { %s53_s8 = sshll.u32 %s3223_s3, 4  ;;  %s2888_s27 = smov [#allocation2]   ;;  %s54_s8 = int_to_ptr.hbm [resolvable:$true] %s53_s8 }
  0x12   :  { %s31_s28 = sshll.u32 %s2888_s27, 4  ;;  %s2889_s29 = smov [#allocation7]   ;;  %s32_s28 = int_to_ptr.vmem [resolvable:$true] %s31_s28 }
  0x13   :  { %34 = dma.hbm_to_vmem [thread:$0]  %s30_s25, 128, %s32_s28, [#allocation3]  }
  0x14   :  { %s55_s30 = sshll.u32 %s2889_s29, 4  ;;  %s76_s0 = sshll.u32 %s3225_s5, 4  ;;  %s56_s30 = int_to_ptr.vmem [resolvable:$true] %s55_s30  ;;  %s77_s0 = int_to_ptr.hbm [resolvable:$true] %s76_s0 }
  0x15   :  { %58 = dma.hbm_to_vmem [thread:$0]  %s54_s8, 128, %s56_s30, [#allocation6]  }
  0x16   :  { %s103_s18 = sshll.u32 %s3227_s7, 4  ;;  %s2890_s4 = smov [#allocation10]   ;;  %s104_s18 = int_to_ptr.hbm [resolvable:$true] %s103_s18 }
  0x17   :  { %s78_s3 = sshll.u32 %s2890_s4, 4  ;;  %s2891_s19 = smov [#allocation13]   ;;  %s79_s3 = int_to_ptr.vmem [resolvable:$true] %s78_s3 }
  0x18   :  { %84 = dma.hbm_to_vmem [thread:$0]  %s77_s0, 3840, %s79_s3, [#allocation9], %s2884_s13, %s2884_s13, %s2885_s14  }
  0x19   :  { %s105_s20 = sshll.u32 %s2891_s19, 4  ;;  %s127_s5 = sshll.u32 %s3229_s9, 4  ;;  %s106_s20 = int_to_ptr.vmem [resolvable:$true] %s105_s20  ;;  %s128_s5 = int_to_ptr.hbm [resolvable:$true] %s127_s5 }
  0x1a   :  { %108 = dma.hbm_to_vmem [thread:$0]  %s104_s18, 240, %s106_s20, [#allocation12]  }
  0x1b   :  { %s137_s7 = sshll.u32 %s3230_s10, 4  ;;  %s2892_s25 = smov [#allocation16]   ;;  %s138_s7 = int_to_ptr.hbm [resolvable:$true] %s137_s7 }
  0x1c   :  { %s129_s6 = sshll.u32 %s2892_s25, 4  ;;  %s2893_s26 = smov [#allocation17]   ;;  %s130_s6 = int_to_ptr.vmem [resolvable:$true] %s129_s6 }
  0x1d   :  { %132 = dma.hbm_to_vmem [thread:$0]  %s128_s5, 16, %s130_s6, [#allocation15]  }
  0x1e   :  { %s139_s13 = sshll.u32 %s2893_s26, 4  ;;  %s2894_s14 = smov 64   ;;  %s140_s13 = int_to_ptr.vmem [resolvable:$true] %s139_s13 }
  0x1f   :  { %s2895_s8 = smov 4  }
  0x20   :  { %145 = dma.hbm_to_vmem [thread:$0]  %s138_s7, 256, %s140_s13, [#allocation18], %s2894_s14, %s2894_s14, %s2895_s8  }
  0x21   :  { %2868 = dma.done.wait [#allocation3], 128  }
  0x22   :  { %2869 = vsyncadd [#allocation3], 4294967168 }
  0x23   :  { %2870 = dma.done.wait [#allocation6], 256  }
  0x24   :  { %2871 = vsyncadd [#allocation6], 4294967040 }
  0x25   :  { %2872 = dma.done.wait [#allocation9], 7680  }
  0x26   :  { %2873 = vsyncadd [#allocation9], 4294959616 }
  0x27   :  { %2874 = dma.done.wait [#allocation12], 4080  }
  0x28   :  { %2875 = vsyncadd [#allocation12], 4294963216 }
  0x29   :  { %2876 = dma.done.wait [#allocation15], 3856  }
  0x2a   :  { %2877 = vsyncadd [#allocation15], 4294963440 }
  0x2b   :  { %2878 = dma.done.wait [#allocation18], 256  }
  0x2c   :  { %2879 = vsyncadd [#allocation18], 4294967040  ;;  %v1984_v0 = vld [vmem:[#allocation10 + $0x78] sm:$0xf]  ;;  %v2508_v1 = vld [vmem:[#allocation10 + $0xb0] sm:$0xf0] }
  0x2d   :  { %v2501_v2 = vld [vmem:[#allocation10 + $0x7c] sm:$0xf]  ;;  %v1985_v3 = vor.u32 %v2508_v1, %v1984_v0  ;;  %v1986_v4 = vld [vmem:[#allocation10 + $0xb4] sm:$0xf0]  ;;  %v1992_v5 = vld [vmem:[#allocation10 + $0x80] sm:$0xf] }
  0x2e   :  { %v2509_v6 = vld [vmem:[#allocation10 + $0xb8] sm:$0xf0]  ;;  %v1989_v7 = vor.u32 %v2501_v2, %v1986_v4  ;;  %v2502_v9 = vld [vmem:[#allocation10 + $0x84] sm:$0xf]  ;;  %v1994_v10 = vld [vmem:[#allocation10 + $0xbc] sm:$0xf0] }
  0x2f   :  { %v1993_v8 = vor.u32 %v2509_v6, %v1992_v5  ;;  %v1924_v11 = vld [vmem:[#allocation10] sm:$0xf]  ;;  %419 = vmatpush.bf16.msra.mxu0 %v1985_v3  ;;  %v1997_v12 = vor.u32 %v2502_v9, %v1994_v10  ;;  %v2493_v13 = vld [vmem:[#allocation10 + $0x38] sm:$0xf0]  ;;  %v2486_v14 = vld [vmem:[#allocation10 + $0x4] sm:$0xf] }
  0x30   :  { %v1926_v15 = vld [vmem:[#allocation10 + $0x3c] sm:$0xf0]  ;;  %432 = vmatpush.bf16.msra.mxu1 %v1989_v7  ;;  %v1925_v16 = vor.u32 %v2493_v13, %v1924_v11  ;;  %v1932_v18 = vld [vmem:[#allocation10 + $0x8] sm:$0xf]  ;;  %v2494_v19 = vld [vmem:[#allocation10 + $0x40] sm:$0xf0] }
  0x31   :  { %445 = vmatpush.bf16.msra.mxu2 %v1993_v8  ;;  %v1929_v17 = vor.u32 %v2486_v14, %v1926_v15  ;;  %v2487_v20 = vld [vmem:[#allocation10 + $0xc] sm:$0xf]  ;;  %458 = vmatpush.bf16.msra.mxu3 %v1997_v12  ;;  %v1933_v21 = vor.u32 %v2494_v19, %v1932_v18  ;;  %v1934_v22 = vld [vmem:[#allocation10 + $0x44] sm:$0xf0]  ;;  %v223_v23 = vld [vmem:[#allocation5] sm:$0xff]  ;;  %vm409_vm0 = vcmask 261120  }
  0x32   :  { %v2000_v24 = vld [vmem:[#allocation10 + $0x88] sm:$0xf]  ;;  %v1937_v25 = vor.u32 %v2487_v20, %v1934_v22  ;;  %v3005_v26 = vpack.c.bf16 %v223_v23, %v223_v23  ;;  %v2510_v27 = vld [vmem:[#allocation10 + $0xc0] sm:$0xf0]  ;;  %v1940_v28 = vld [vmem:[#allocation10 + $0x10] sm:$0xf] }
  0x33   :  { %v2495_v29 = vld [vmem:[#allocation10 + $0x48] sm:$0xf0]  ;;  %420 = vmatpush.bf16.msra.mxu0 %v1925_v16  ;;  %v2001_v30 = vor.u32 %v2510_v27, %v2000_v24  ;;  %v2504_v31 = vld [vmem:[#allocation10 + $0x94] sm:$0xf]  ;;  %v2010_v32 = vld [vmem:[#allocation10 + $0xcc] sm:$0xf0] }
  0x34   :  { %v2503_v33 = vld [vmem:[#allocation10 + $0x8c] sm:$0xf]  ;;  %433 = vmatpush.bf16.msra.mxu1 %v1929_v17  ;;  %v2013_v34 = vor.u32 %v2504_v31, %v2010_v32  ;;  %v2002_v35 = vld [vmem:[#allocation10 + $0xc4] sm:$0xf0]  ;;  %v2008_v36 = vld [vmem:[#allocation10 + $0x90] sm:$0xf]  ;;  %v1941_v38 = vor.u32 %v2495_v29, %v1940_v28 }
  0x35   :  { %446 = vmatpush.bf16.msra.mxu2 %v1933_v21  ;;  %v2511_v37 = vld [vmem:[#allocation10 + $0xc8] sm:$0xf0]  ;;  %459 = vmatpush.bf16.msra.mxu3 %v1937_v25  ;;  %v2005_v39 = vor.u32 %v2503_v33, %v2002_v35  ;;  %v2488_v41 = vld [vmem:[#allocation10 + $0x14] sm:$0xf]  ;;  %v1942_v42 = vld [vmem:[#allocation10 + $0x4c] sm:$0xf0] }
  0x36   :  { %v2009_v40 = vor.u32 %v2511_v37, %v2008_v36  ;;  %v1948_v43 = vld [vmem:[#allocation10 + $0x18] sm:$0xf]  ;;  %2042 = vmatmul.msk.bf16.vlgmr.msra.gmra.mxu0 %vm409_vm0, %v3005_v26  ;;  %v2496_v44 = vld [vmem:[#allocation10 + $0x50] sm:$0xf0]  ;;  %v2489_v45 = vld [vmem:[#allocation10 + $0x1c] sm:$0xf]  ;;  %v1945_v51 = vor.u32 %v2488_v41, %v1942_v42 }
  0x37   :  { %471 = vmatpush.bf16.msrb.mxu0 %v2001_v30  ;;  %v1950_v46 = vld [vmem:[#allocation10 + $0x54] sm:$0xf0]  ;;  %2043 = vmatmul.msk.bf16.vlgmr.msra.gmra.mxu1 %vm409_vm0, %v3005_v26  ;;  %v2512_v49 = vld [vmem:[#allocation10 + $0xd0] sm:$0xf0]  ;;  %v1956_v50 = vld [vmem:[#allocation10 + $0x20] sm:$0xf]  ;;  %v1949_v56 = vor.u32 %v2496_v44, %v1948_v43 }
  0x38   :  { %2044 = vmatmul.msk.bf16.vlgmr.msra.gmra.mxu2 %vm409_vm0, %v3005_v26  ;;  %v1953_v47 = vor.u32 %v2489_v45, %v1950_v46  ;;  %v2016_v48 = vld [vmem:[#allocation10 + $0x98] sm:$0xf]  ;;  %2045 = vmatmul.msk.bf16.vlgmr.msra.gmra.mxu3 %vm409_vm0, %v3005_v26  ;;  %v2497_v53 = vld [vmem:[#allocation10 + $0x58] sm:$0xf0]  ;;  %v2506_v54 = vld [vmem:[#allocation10 + $0xa4] sm:$0xf] }
  0x39   :  { %510 = vmatpush.bf16.msrb.mxu3 %v2013_v34  ;;  %484 = vmatpush.bf16.msrb.mxu1 %v2005_v39  ;;  %v2017_v52 = vor.u32 %v2512_v49, %v2016_v48  ;;  %v2026_v55 = vld [vmem:[#allocation10 + $0xdc] sm:$0xf0]  ;;  %v2505_v58 = vld [vmem:[#allocation10 + $0x9c] sm:$0xf]  ;;  %v2018_v59 = vld [vmem:[#allocation10 + $0xd4] sm:$0xf0]  ;;  %v1957_v61 = vor.u32 %v2497_v53, %v1956_v50 }
  0x3a   :  { %497 = vmatpush.bf16.msrb.mxu2 %v2009_v40  ;;  %v2029_v57 = vor.u32 %v2506_v54, %v2026_v55  ;;  %v2024_v60 = vld [vmem:[#allocation10 + $0xa0] sm:$0xf]  ;;  %v2021_v62 = vor.u32 %v2505_v58, %v2018_v59  ;;  %v2513_v63 = vld [vmem:[#allocation10 + $0xd8] sm:$0xf0]  ;;  %v2490_v0 = vld [vmem:[#allocation10 + $0x24] sm:$0xf] }
  0x3b   :  { %472 = vmatpush.bf16.msrb.mxu0 %v1941_v38  ;;  %v1958_v1 = vld [vmem:[#allocation10 + $0x5c] sm:$0xf0]  ;;  %v2025_v2 = vor.u32 %v2513_v63, %v2024_v60  ;;  %v1964_v3 = vld [vmem:[#allocation10 + $0x28] sm:$0xf]  ;;  %v2498_v4 = vld [vmem:[#allocation10 + $0x60] sm:$0xf0] }
  0x3c   :  { %v2491_v5 = vld [vmem:[#allocation10 + $0x2c] sm:$0xf]  ;;  %v1966_v6 = vld [vmem:[#allocation10 + $0x64] sm:$0xf0]  ;;  %v1961_v7 = vor.u32 %v2490_v0, %v1958_v1  ;;  %v1965_v9 = vor.u32 %v2498_v4, %v1964_v3  ;;  %v2514_v11 = vld [vmem:[#allocation10 + $0xe0] sm:$0xf0] }
  0x3d   :  { %511 = vmatpush.bf16.msrb.mxu3 %v1953_v47  ;;  %485 = vmatpush.bf16.msrb.mxu1 %v1945_v51  ;;  %v1969_v8 = vor.u32 %v2491_v5, %v1966_v6  ;;  %v2032_v10 = vld [vmem:[#allocation10 + $0xa8] sm:$0xf]  ;;  %v2478_v13 = vld [vmem:[#allocation8 + $0xb0] sm:$0xf0]  ;;  %v2507_v14 = vld [vmem:[#allocation10 + $0xac] sm:$0xf] }
  0x3e   :  { %498 = vmatpush.bf16.msrb.mxu2 %v1949_v56  ;;  %v2119_v12 = vld [vmem:[#allocation8 + $0x78] sm:$0xf]  ;;  %v2040_v16 = vld [vmem:[#allocation10 + $0xb0] sm:$0xf]  ;;  %v2515_v17 = vld [vmem:[#allocation10 + $0xe8] sm:$0xf0]  ;;  %v2033_v18 = vor.u32 %v2514_v11, %v2032_v10 }
  0x3f   :  { %523 = vmatpush.bf16.msra.mxu0 %v2017_v52  ;;  %v2034_v15 = vld [vmem:[#allocation10 + $0xe4] sm:$0xf0]  ;;  %v1972_v19 = vld [vmem:[#allocation10 + $0x30] sm:$0xf]  ;;  %v2499_v20 = vld [vmem:[#allocation10 + $0x68] sm:$0xf0]  ;;  %v2120_v21 = vor.u32 %v2478_v13, %v2119_v12  ;;  %v2041_v24 = vor.u32 %v2515_v17, %v2040_v16 }
  0x40   :  { %v2037_v22 = vor.u32 %v2507_v14, %v2034_v15  ;;  %v2492_v23 = vld [vmem:[#allocation10 + $0x34] sm:$0xf]  ;;  %v1974_v25 = vld [vmem:[#allocation10 + $0x6c] sm:$0xf0]  ;;  %v2463_v28 = vld [vmem:[#allocation8 + $0x38] sm:$0xf0]  ;;  %v1973_v31 = vor.u32 %v2499_v20, %v1972_v19 }
  0x41   :  { %562 = vmatpush.bf16.msra.mxu3 %v2029_v57  ;;  %536 = vmatpush.bf16.msra.mxu1 %v2021_v62  ;;  %v2059_v27 = vld [vmem:[#allocation8] sm:$0xf]  ;;  %v1980_v29 = vld [vmem:[#allocation10 + $0x38] sm:$0xf]  ;;  %v2500_v30 = vld [vmem:[#allocation10 + $0x70] sm:$0xf0]  ;;  %v1977_v32 = vor.u32 %v2492_v23, %v1974_v25 }
  0x42   :  { %549 = vmatpush.bf16.msra.mxu2 %v2025_v2  ;;  %v2060_v33 = vor.u32 %v2463_v28, %v2059_v27  ;;  %v1981_v34 = vor.u32 %v2500_v30, %v1980_v29  ;;  %v2471_v35 = vld [vmem:[#allocation8 + $0x7c] sm:$0xf]  ;;  %v2121_v36 = vld [vmem:[#allocation8 + $0xb4] sm:$0xf0]  ;;  %v2135_v37 = vld [vmem:[#allocation8 + $0x88] sm:$0xf] }
  0x43   :  { %524 = vmatpush.bf16.msra.mxu0 %v1957_v61  ;;  %v2480_v38 = vld [vmem:[#allocation8 + $0xc0] sm:$0xf0]  ;;  %v2127_v39 = vld [vmem:[#allocation8 + $0x80] sm:$0xf]  ;;  %v2479_v40 = vld [vmem:[#allocation8 + $0xb8] sm:$0xf0]  ;;  %v2124_v43 = vor.u32 %v2471_v35, %v2121_v36 }
  0x44   :  { %v2472_v41 = vld [vmem:[#allocation8 + $0x84] sm:$0xf]  ;;  %v2129_v42 = vld [vmem:[#allocation8 + $0xbc] sm:$0xf0]  ;;  %v2136_v46 = vor.u32 %v2480_v38, %v2135_v37  ;;  %v2128_v47 = vor.u32 %v2479_v40, %v2127_v39  ;;  %v2067_v48 = vld [vmem:[#allocation8 + $0x8] sm:$0xf] }
  0x45   :  { %563 = vmatpush.bf16.msra.mxu3 %v1969_v8  ;;  %537 = vmatpush.bf16.msra.mxu1 %v1961_v7  ;;  %v2456_v44 = vld [vmem:[#allocation8 + $0x4] sm:$0xf]  ;;  %v2061_v45 = vld [vmem:[#allocation8 + $0x3c] sm:$0xf0]  ;;  %v2132_v49 = vor.u32 %v2472_v41, %v2129_v42  ;;  %v2075_v51 = vld [vmem:[#allocation8 + $0x10] sm:$0xf] }
  0x46   :  { %550 = vmatpush.bf16.msra.mxu2 %v1965_v9  ;;  %2046 = vmatmul.msk.bf16.vlgmr.msrb.gmra.mxu0 %vm409_vm0, %v3005_v26  ;;  %v2464_v50 = vld [vmem:[#allocation8 + $0x40] sm:$0xf0]  ;;  %v2465_v52 = vld [vmem:[#allocation8 + $0x48] sm:$0xf0]  ;;  %v2069_v54 = vld [vmem:[#allocation8 + $0x44] sm:$0xf0]  ;;  %v2064_v55 = vor.u32 %v2456_v44, %v2061_v45 }
  0x47   :  { %2047 = vmatmul.msk.bf16.vlgmr.msrb.gmra.mxu1 %vm409_vm0, %v3005_v26  ;;  %575 = vmatpush.bf16.msrb.mxu0 %v2033_v18  ;;  %v2457_v53 = vld [vmem:[#allocation8 + $0xc] sm:$0xf]  ;;  %v2068_v56 = vor.u32 %v2464_v50, %v2067_v48  ;;  %v2076_v57 = vor.u32 %v2465_v52, %v2075_v51  ;;  %v2137_v61 = vld [vmem:[#allocation8 + $0xc4] sm:$0xf0]  ;;  %v2151_v62 = vld [vmem:[#allocation8 + $0x98] sm:$0xf] }
  0x48   :  { %2048 = vmatmul.msk.bf16.vlgmr.msrb.gmra.mxu2 %vm409_vm0, %v3005_v26  ;;  %2049 = vmatmul.msk.bf16.vlgmr.msrb.gmra.mxu3 %vm409_vm0, %v3005_v26  ;;  %v2072_v58 = vor.u32 %v2457_v53, %v2069_v54  ;;  %v189_v59 = vld [vmem:[#allocation2] sm:$0xff]  ;;  %v2482_v63 = vld [vmem:[#allocation8 + $0xd0] sm:$0xf0]  ;;  %v2143_v0 = vld [vmem:[#allocation8 + $0x90] sm:$0xf]  ;;  %s1907_s1 = sshll.u32 %s3232_s12, 4  ;;  %s1908_s1 = int_to_ptr.hbm [resolvable:$true] %s1907_s1 }
  0x49   :  { %769 = vmatpush.bf16.msrb.mxu3 %v2120_v21  ;;  %588 = vmatpush.bf16.msrb.mxu1 %v2037_v22  ;;  %v2473_v60 = vld [vmem:[#allocation8 + $0x8c] sm:$0xf]  ;;  %v2474_v2 = vld [vmem:[#allocation8 + $0x94] sm:$0xf]  ;;  %v2145_v3 = vld [vmem:[#allocation8 + $0xcc] sm:$0xf0]  ;;  %v3031_v4 = vpack.c.bf16 %v189_v59, %v189_v59  ;;  %v2152_v8 = vor.u32 %v2482_v63, %v2151_v62 }
  0x4a   :  { %601 = vmatpush.bf16.msrb.mxu2 %v2041_v24  ;;  %v2481_v1 = vld [vmem:[#allocation8 + $0xc8] sm:$0xf0]  ;;  %v2140_v5 = vor.u32 %v2473_v60, %v2137_v61  ;;  %v2458_v6 = vld [vmem:[#allocation8 + $0x14] sm:$0xf]  ;;  %v2077_v7 = vld [vmem:[#allocation8 + $0x4c] sm:$0xf0]  ;;  %v2148_v11 = vor.u32 %v2474_v2, %v2145_v3 }
  0x4b   :  { %576 = vmatpush.bf16.msrb.mxu0 %v1973_v31  ;;  %v2144_v9 = vor.u32 %v2481_v1, %v2143_v0  ;;  %v2083_v10 = vld [vmem:[#allocation8 + $0x18] sm:$0xf]  ;;  %v2466_v12 = vld [vmem:[#allocation8 + $0x50] sm:$0xf0]  ;;  %v2091_v13 = vld [vmem:[#allocation8 + $0x20] sm:$0xf]  ;;  %v2080_v17 = vor.u32 %v2458_v6, %v2077_v7 }
  0x4c   :  { %v2467_v14 = vld [vmem:[#allocation8 + $0x58] sm:$0xf0]  ;;  %v2085_v16 = vld [vmem:[#allocation8 + $0x54] sm:$0xf0]  ;;  %v2084_v18 = vor.u32 %v2466_v12, %v2083_v10  ;;  %v2484_v23 = vld [vmem:[#allocation8 + $0xe0] sm:$0xf0] }
  0x4d   :  { %589 = vmatpush.bf16.msrb.mxu1 %v1977_v32  ;;  %770 = vmatpush.bf16.msrb.mxu3 %v2060_v33  ;;  %v2459_v15 = vld [vmem:[#allocation8 + $0x1c] sm:$0xf]  ;;  %v2092_v19 = vor.u32 %v2467_v14, %v2091_v13  ;;  %v2153_v22 = vld [vmem:[#allocation8 + $0xd4] sm:$0xf0]  ;;  %v2159_v24 = vld [vmem:[#allocation8 + $0xa0] sm:$0xf] }
  0x4e   :  { %602 = vmatpush.bf16.msrb.mxu2 %v1981_v34  ;;  %v2088_v20 = vor.u32 %v2459_v15, %v2085_v16  ;;  %v2475_v21 = vld [vmem:[#allocation8 + $0x9c] sm:$0xf]  ;;  %v2476_v27 = vld [vmem:[#allocation8 + $0xa4] sm:$0xf]  ;;  %v2161_v28 = vld [vmem:[#allocation8 + $0xdc] sm:$0xf0] }
  0x4f   :  { %v2483_v25 = vld [vmem:[#allocation8 + $0xd8] sm:$0xf0]  ;;  %v2156_v29 = vor.u32 %v2475_v21, %v2153_v22  ;;  %v2460_v30 = vld [vmem:[#allocation8 + $0x24] sm:$0xf]  ;;  %v2093_v31 = vld [vmem:[#allocation8 + $0x5c] sm:$0xf0]  ;;  %v2164_v35 = vor.u32 %v2476_v27, %v2161_v28 }
  0x50   :  { %v2160_v33 = vor.u32 %v2483_v25, %v2159_v24  ;;  %v2099_v34 = vld [vmem:[#allocation8 + $0x28] sm:$0xf]  ;;  %v2468_v36 = vld [vmem:[#allocation8 + $0x60] sm:$0xf0]  ;;  %v2107_v37 = vld [vmem:[#allocation8 + $0x30] sm:$0xf]  ;;  %v2096_v41 = vor.u32 %v2460_v30, %v2093_v31 }
  0x51   :  { %v2469_v38 = vld [vmem:[#allocation8 + $0x68] sm:$0xf0]  ;;  %v2101_v40 = vld [vmem:[#allocation8 + $0x64] sm:$0xf0]  ;;  %v2100_v42 = vor.u32 %v2468_v36, %v2099_v34  ;;  %v2256_v48 = vld [vmem:[#allocation11 + $0xb4] sm:$0xf0] }
  0x52   :  { %v2461_v39 = vld [vmem:[#allocation8 + $0x2c] sm:$0xf]  ;;  %v2254_v51 = vld [vmem:[#allocation11 + $0x78] sm:$0xf]  ;;  %v2538_v52 = vld [vmem:[#allocation11 + $0xb0] sm:$0xf0] }
  0x53   :  { %v2104_v44 = vor.u32 %v2461_v39, %v2101_v40  ;;  %v2477_v45 = vld [vmem:[#allocation8 + $0xac] sm:$0xf]  ;;  %v2462_v54 = vld [vmem:[#allocation8 + $0x34] sm:$0xf]  ;;  %v2255_v59 = vor.u32 %v2538_v52, %v2254_v51  ;;  %v2516_v61 = vld [vmem:[#allocation11 + $0x4] sm:$0xf] }
  0x54   :  { %v2485_v50 = vld [vmem:[#allocation8 + $0xe8] sm:$0xf0]  ;;  %v2470_v60 = vld [vmem:[#allocation8 + $0x70] sm:$0xf0]  ;;  %v2196_v62 = vld [vmem:[#allocation11 + $0x3c] sm:$0xf0] }
  0x55   :  { %v2194_v63 = vld [vmem:[#allocation11] sm:$0xf]  ;;  %v2523_v0 = vld [vmem:[#allocation11 + $0x38] sm:$0xf0]  ;;  %v2199_v3 = vor.u32 %v2516_v61, %v2196_v62  ;;  %v2532_v10 = vld [vmem:[#allocation11 + $0x84] sm:$0xf] }
  0x56   :  { %2050 = vmatmul.msk.bf16.vlgmr.msra.gmra.mxu0 %vm409_vm0, %v3005_v26  ;;  %v2262_v6 = vld [vmem:[#allocation11 + $0x80] sm:$0xf]  ;;  %v2539_v7 = vld [vmem:[#allocation11 + $0xb8] sm:$0xf0]  ;;  %v2270_v12 = vld [vmem:[#allocation11 + $0x88] sm:$0xf] }
  0x57   :  { %2051 = vmatmul.msk.bf16.vlgmr.msra.gmra.mxu1 %vm409_vm0, %v3005_v26  ;;  %782 = vmatpush.bf16.msra.mxu0 %v2124_v43  ;;  %v2108_v43 = vor.u32 %v2469_v38, %v2107_v37  ;;  %v2540_v13 = vld [vmem:[#allocation11 + $0xc0] sm:$0xf0]  ;;  %v2263_v14 = vor.u32 %v2539_v7, %v2262_v6  ;;  %v2202_v15 = vld [vmem:[#allocation11 + $0x8] sm:$0xf]  ;;  %v2518_v22 = vld [vmem:[#allocation11 + $0x14] sm:$0xf] }
  0x58   :  { %2052 = vmatmul.msk.bf16.vlgmr.msra.gmra.mxu2 %vm409_vm0, %v3005_v26  ;;  %2053 = vmatmul.msk.bf16.vlgmr.msra.gmra.mxu3 %vm409_vm0, %v3005_v26  ;;  %v2524_v16 = vld [vmem:[#allocation11 + $0x40] sm:$0xf0]  ;;  %v2204_v21 = vld [vmem:[#allocation11 + $0x44] sm:$0xf0]  ;;  %v2525_v24 = vld [vmem:[#allocation11 + $0x48] sm:$0xf0] }
  0x59   :  { %821 = vmatpush.bf16.msra.mxu3 %v2136_v46  ;;  %795 = vmatpush.bf16.msra.mxu1 %v2128_v47  ;;  %v2169_v46 = vld [vmem:[#allocation8 + $0xe4] sm:$0xf0]  ;;  %v2531_v47 = vld [vmem:[#allocation11 + $0x7c] sm:$0xf]  ;;  %v2203_v25 = vor.u32 %v2524_v16, %v2202_v15  ;;  %v2278_v31 = vld [vmem:[#allocation11 + $0x90] sm:$0xf] }
  0x5a   :  { %808 = vmatpush.bf16.msra.mxu2 %v2132_v49  ;;  %v2175_v49 = vld [vmem:[#allocation8 + $0xb0] sm:$0xf]  ;;  %v2172_v53 = vor.u32 %v2477_v45, %v2169_v46  ;;  %v958_v30 = vld [vmem:[%s3222_s2] sm:$0xff]  ;;  %v2288_v34 = vld [vmem:[#allocation11 + $0xd4] sm:$0xf0] }
  0x5b   :  { %783 = vmatpush.bf16.msra.mxu0 %v2064_v55  ;;  %v2109_v55 = vld [vmem:[#allocation8 + $0x6c] sm:$0xf0]  ;;  %v3068_v37 = vpack.c.bf16 %v958_v30, %v958_v30  ;;  %v2286_v38 = vld [vmem:[#allocation11 + $0x98] sm:$0xf]  ;;  %v2542_v39 = vld [vmem:[#allocation11 + $0xd0] sm:$0xf0] }
  0x5c   :  { %v2112_v1 = vor.u32 %v2462_v54, %v2109_v55  ;;  %v2280_v36 = vld [vmem:[#allocation11 + $0xcc] sm:$0xf0]  ;;  %v2519_v45 = vld [vmem:[#allocation11 + $0x1c] sm:$0xf]  ;;  %v2287_v46 = vor.u32 %v2542_v39, %v2286_v38  ;;  %v2302_v62 = vld [vmem:[#allocation11 + $0xa8] sm:$0xf] }
  0x5d   :  { %796 = vmatpush.bf16.msra.mxu1 %v2068_v56  ;;  %822 = vmatpush.bf16.msra.mxu3 %v2076_v57  ;;  %v2259_v56 = vor.u32 %v2531_v47, %v2256_v48  ;;  %v2176_v57 = vor.u32 %v2485_v50, %v2175_v49  ;;  %v2220_v47 = vld [vmem:[#allocation11 + $0x54] sm:$0xf0]  ;;  %v2520_v48 = vld [vmem:[#allocation11 + $0x24] sm:$0xf]  ;;  %v2228_v49 = vld [vmem:[#allocation11 + $0x5c] sm:$0xf0] }
  0x5e   :  { %809 = vmatpush.bf16.msra.mxu2 %v2072_v58  ;;  %v2115_v58 = vld [vmem:[#allocation8 + $0x38] sm:$0xf]  ;;  %v2226_v50 = vld [vmem:[#allocation11 + $0x20] sm:$0xf]  ;;  %v2527_v51 = vld [vmem:[#allocation11 + $0x58] sm:$0xf0]  ;;  %v2231_v54 = vor.u32 %v2520_v48, %v2228_v49 }
  0x5f   :  { %v2116_v2 = vor.u32 %v2470_v60, %v2115_v58  ;;  %v2227_v55 = vor.u32 %v2527_v51, %v2226_v50  ;;  %v2304_v58 = vld [vmem:[#allocation11 + $0xe4] sm:$0xf0]  ;;  %v2296_v60 = vld [vmem:[#allocation11 + $0xdc] sm:$0xf0]  ;;  %v2521_v7 = vld [vmem:[#allocation11 + $0x2c] sm:$0xf] }
  0x60   :  { %v2530_v30 = vld [vmem:[#allocation11 + $0x70] sm:$0xf0] }
  0x66   :  { %2054 = vmatmul.msk.bf16.vlgmr.msrb.gmra.mxu0 %vm409_vm0, %v3005_v26 }
  0x67   :  { %2055 = vmatmul.msk.bf16.vlgmr.msrb.gmra.mxu1 %vm409_vm0, %v3005_v26  ;;  %834 = vmatpush.bf16.msrb.mxu0 %v2140_v5  ;;  %v2195_v5 = vor.u32 %v2523_v0, %v2194_v63  ;;  %v2544_v63 = vld [vmem:[#allocation11 + $0xe0] sm:$0xf0] }
  0x68   :  { %2056 = vmatmul.msk.bf16.vlgmr.msrb.gmra.mxu2 %vm409_vm0, %v3005_v26  ;;  %2177 = vmatmul.msk.bf16.vlgmr.msrb.gmra.mxu3 %vm409_vm0, %v3031_v4  ;;  %v2167_v26 = vld [vmem:[#allocation8 + $0xa8] sm:$0xf] }
  0x69   :  { %873 = vmatpush.bf16.msrb.mxu3 %v2152_v8  ;;  %847 = vmatpush.bf16.msrb.mxu1 %v2144_v9  ;;  %v2168_v32 = vor.u32 %v2484_v23, %v2167_v26  ;;  %v2533_v8 = vld [vmem:[#allocation11 + $0x8c] sm:$0xf]  ;;  %v2272_v9 = vld [vmem:[#allocation11 + $0xc4] sm:$0xf0]  ;;  %v2212_v26 = vld [vmem:[#allocation11 + $0x4c] sm:$0xf0] }
  0x6a   :  { %860 = vmatpush.bf16.msrb.mxu2 %v2148_v11  ;;  %v2264_v11 = vld [vmem:[#allocation11 + $0xbc] sm:$0xf0]  ;;  %v2210_v23 = vld [vmem:[#allocation11 + $0x10] sm:$0xf]  ;;  %v2215_v28 = vor.u32 %v2518_v22, %v2212_v26  ;;  %v2545_v26 = vld [vmem:[#allocation11 + $0xe8] sm:$0xf0] }
  0x6b   :  { %835 = vmatpush.bf16.msrb.mxu0 %v2080_v17  ;;  %v2275_v17 = vor.u32 %v2533_v8, %v2272_v9  ;;  %v2303_v8 = vor.u32 %v2544_v63, %v2302_v62  ;;  %v2236_v9 = vld [vmem:[#allocation11 + $0x64] sm:$0xf0]  ;;  %v2310_v22 = vld [vmem:[#allocation11 + $0xb0] sm:$0xf]  ;;  %v2568_v62 = vld [vmem:[#allocation14 + $0xb0] sm:$0xf0] }
  0x6c   :  { %v2239_v15 = vor.u32 %v2521_v7, %v2236_v9  ;;  %v2561_v63 = vld [vmem:[#allocation14 + $0x7c] sm:$0xf]  ;;  %v2329_v9 = vld [vmem:[#allocation14] sm:$0xf] }
  0x6d   :  { %848 = vmatpush.bf16.msrb.mxu1 %v2084_v18  ;;  %874 = vmatpush.bf16.msrb.mxu3 %v2092_v19  ;;  %v2267_v18 = vor.u32 %v2532_v10, %v2264_v11  ;;  %v2517_v19 = vld [vmem:[#allocation11 + $0xc] sm:$0xf]  ;;  %v2522_v10 = vld [vmem:[#allocation11 + $0x34] sm:$0xf]  ;;  %v2244_v11 = vld [vmem:[#allocation11 + $0x6c] sm:$0xf0] }
  0x6e   :  { %861 = vmatpush.bf16.msrb.mxu2 %v2088_v20  ;;  %v2271_v20 = vor.u32 %v2540_v13, %v2270_v12  ;;  %v2207_v27 = vor.u32 %v2517_v19, %v2204_v21  ;;  %v2242_v12 = vld [vmem:[#allocation11 + $0x30] sm:$0xf]  ;;  %v2529_v13 = vld [vmem:[#allocation11 + $0x68] sm:$0xf0]  ;;  %v2247_v16 = vor.u32 %v2522_v10, %v2244_v11  ;;  %v2553_v10 = vld [vmem:[#allocation14 + $0x38] sm:$0xf0] }
  0x6f   :  { %v2546_v11 = vld [vmem:[#allocation14 + $0x4] sm:$0xf] }
  0x76   :  { %2178 = vmatmul.msk.bf16.vlgmr.msra.gmra.mxu0 %vm409_vm0, %v3031_v4 }
  0x77   :  { %2179 = vmatmul.msk.bf16.vlgmr.msra.gmra.mxu1 %vm409_vm0, %v3031_v4  ;;  %886 = vmatpush.bf16.msra.mxu0 %v2156_v29  ;;  %v2211_v29 = vor.u32 %v2525_v24, %v2210_v23 }
  0x78   :  { %2180 = vmatmul.msk.bf16.vlgmr.msra.gmra.mxu2 %vm409_vm0, %v3031_v4  ;;  %2181 = vmatmul.msk.bf16.vlgmr.msra.gmra.mxu3 %vm409_vm0, %v3031_v4 }
  0x79   :  { %925 = vmatpush.bf16.msra.mxu3 %v2168_v32  ;;  %899 = vmatpush.bf16.msra.mxu1 %v2160_v33  ;;  %v2541_v32 = vld [vmem:[#allocation11 + $0xc8] sm:$0xf0]  ;;  %v2535_v33 = vld [vmem:[#allocation11 + $0x9c] sm:$0xf] }
  0x7a   :  { %912 = vmatpush.bf16.msra.mxu2 %v2164_v35  ;;  %v2534_v35 = vld [vmem:[#allocation11 + $0x94] sm:$0xf]  ;;  %v2279_v40 = vor.u32 %v2541_v32, %v2278_v31 }
  0x7b   :  { %887 = vmatpush.bf16.msra.mxu0 %v2096_v41  ;;  %v2218_v41 = vld [vmem:[#allocation11 + $0x18] sm:$0xf] }
  0x7d   :  { %900 = vmatpush.bf16.msra.mxu1 %v2100_v42  ;;  %926 = vmatpush.bf16.msra.mxu3 %v2108_v43  ;;  %v2526_v42 = vld [vmem:[#allocation11 + $0x50] sm:$0xf0]  ;;  %v2291_v43 = vor.u32 %v2535_v33, %v2288_v34 }
  0x7e   :  { %913 = vmatpush.bf16.msra.mxu2 %v2104_v44  ;;  %v2283_v44 = vor.u32 %v2534_v35, %v2280_v36  ;;  %v2219_v52 = vor.u32 %v2526_v42, %v2218_v41 }
  0x86   :  { %2182 = vmatmul.msk.bf16.vlgmr.msrb.gmra.mxu0 %vm409_vm0, %v3031_v4 }
  0x87   :  { %2183 = vmatmul.msk.bf16.vlgmr.msrb.gmra.mxu1 %vm409_vm0, %v3031_v4  ;;  %938 = vmatpush.bf16.msrb.mxu0 %v2172_v53  ;;  %v2223_v53 = vor.u32 %v2519_v45, %v2220_v47 }
  0x88   :  { %2184 = vmatmul.msk.bf16.vlgmr.msrb.gmra.mxu2 %vm409_vm0, %v3031_v4  ;;  %2185 = vmatmul.msk.bf16.vlgmr.msrb.gmra.mxu3 %vm409_vm0, %v3031_v4 }
  0x89   :  { %1166 = vmatpush.bf16.msrb.mxu3 %v2259_v56  ;;  %951 = vmatpush.bf16.msrb.mxu1 %v2176_v57  ;;  %v2543_v56 = vld [vmem:[#allocation11 + $0xd8] sm:$0xf0]  ;;  %v2537_v57 = vld [vmem:[#allocation11 + $0xac] sm:$0xf] }
  0x8a   :  { %1153 = vmatpush.bf16.msrb.mxu2 %v2255_v59  ;;  %v2536_v59 = vld [vmem:[#allocation11 + $0xa4] sm:$0xf] }
  0x8b   :  { %939 = vmatpush.bf16.msrb.mxu0 %v2112_v1  ;;  %v2299_v6 = vor.u32 %v2536_v59, %v2296_v60 }
  0x8d   :  { %952 = vmatpush.bf16.msrb.mxu1 %v2116_v2  ;;  %1167 = vmatpush.bf16.msrb.mxu3 %v2199_v3  ;;  %v2234_v2 = vld [vmem:[#allocation11 + $0x28] sm:$0xf]  ;;  %v2528_v3 = vld [vmem:[#allocation11 + $0x60] sm:$0xf0] }
  0x8e   :  { %1154 = vmatpush.bf16.msrb.mxu2 %v2195_v5  ;;  %v2307_v5 = vor.u32 %v2537_v57, %v2304_v58 }
  0x96   :  { %2186 = vmatmul.msk.bf16.vlgmr.msra.gmra.mxu0 %vm409_vm0, %v3031_v4 }
  0x97   :  { %2187 = vmatmul.msk.bf16.vlgmr.msra.gmra.mxu1 %vm409_vm0, %v3031_v4  ;;  %1179 = vmatpush.bf16.msra.mxu0 %v2263_v14  ;;  %v2235_v14 = vor.u32 %v2528_v3, %v2234_v2 }
  0x98   :  { %2188 = vmatmul.msk.bf16.vlgmr.msra.gmra.mxu2 %vm409_vm0, %v3031_v4  ;;  %2189 = vmatmul.msk.bf16.vlgmr.msra.gmra.mxu3 %vm409_vm0, %v3031_v4 }
  0x99   :  { %1218 = vmatpush.bf16.msra.mxu3 %v2275_v17  ;;  %1192 = vmatpush.bf16.msra.mxu1 %v2267_v18  ;;  %v2243_v18 = vor.u32 %v2529_v13, %v2242_v12 }
  0x9a   :  { %1205 = vmatpush.bf16.msra.mxu2 %v2271_v20 }
  0x9b   :  { %1180 = vmatpush.bf16.msra.mxu0 %v2203_v25 }
  0x9d   :  { %1193 = vmatpush.bf16.msra.mxu1 %v2207_v27  ;;  %1219 = vmatpush.bf16.msra.mxu3 %v2215_v28  ;;  %v2311_v28 = vor.u32 %v2545_v26, %v2310_v22  ;;  %v2562_v26 = vld [vmem:[#allocation14 + $0x84] sm:$0xf] }
  0x9e   :  { %1206 = vmatpush.bf16.msra.mxu2 %v2211_v29  ;;  %v2250_v29 = vld [vmem:[#allocation11 + $0x38] sm:$0xf] }
  0x9f   :  { %v2251_v31 = vor.u32 %v2530_v30, %v2250_v29  ;;  %v2405_v29 = vld [vmem:[#allocation14 + $0x88] sm:$0xf]  ;;  %v2570_v30 = vld [vmem:[#allocation14 + $0xc0] sm:$0xf0] }
  0xa6   :  { %2190 = vmatmul.msk.bf16.vlgmr.msrb.gmra.mxu0 %vm409_vm0, %v3031_v4 }
  0xa7   :  { %2191 = vmatmul.msk.bf16.vlgmr.msrb.gmra.mxu1 %vm409_vm0, %v3031_v4  ;;  %1231 = vmatpush.bf16.msrb.mxu0 %v2279_v40  ;;  %v2294_v4 = vld [vmem:[#allocation11 + $0xa0] sm:$0xf] }
  0xa8   :  { %2312 = vmatmul.msk.bf16.vlgmr.msrb.gmra.mxu2 %vm409_vm0, %v3068_v37  ;;  %2313 = vmatmul.msk.bf16.vlgmr.msrb.gmra.mxu3 %vm409_vm0, %v3068_v37  ;;  %v2295_v1 = vor.u32 %v2543_v56, %v2294_v4 }
  0xa9   :  { %1270 = vmatpush.bf16.msrb.mxu3 %v2291_v43  ;;  %1244 = vmatpush.bf16.msrb.mxu1 %v2283_v44 }
  0xaa   :  { %1257 = vmatpush.bf16.msrb.mxu2 %v2287_v46 }
  0xab   :  { %1232 = vmatpush.bf16.msrb.mxu0 %v2219_v52 }
  0xad   :  { %1245 = vmatpush.bf16.msrb.mxu1 %v2223_v53  ;;  %1271 = vmatpush.bf16.msrb.mxu3 %v2231_v54 }
  0xae   :  { %1258 = vmatpush.bf16.msrb.mxu2 %v2227_v55 }
  0xb3   :  { %v3078_v61 = vpop.f32.mrf.mxu0 }
  0xb4   :  { %v3080_v0 = vpop.f32.mrf.mxu1 }
  0xb6   :  { %2314 = vmatmul.msk.bf16.vlgmr.msra.gmra.mxu0 %vm409_vm0, %v3068_v37 }
  0xb7   :  { %2315 = vmatmul.msk.bf16.vlgmr.msra.gmra.mxu1 %vm409_vm0, %v3068_v37  ;;  %1283 = vmatpush.bf16.msra.mxu0 %v2295_v1 }
  0xb8   :  { %2316 = vmatmul.msk.bf16.vlgmr.msra.gmra.mxu2 %vm409_vm0, %v3068_v37  ;;  %2317 = vmatmul.msk.bf16.vlgmr.msra.gmra.mxu3 %vm409_vm0, %v3068_v37 }
  0xb9   :  { %1322 = vmatpush.bf16.msra.mxu3 %v2307_v5  ;;  %1296 = vmatpush.bf16.msra.mxu1 %v2299_v6  ;;  %v2391_v5 = vld [vmem:[#allocation14 + $0xb4] sm:$0xf0] }
  0xba   :  { %1309 = vmatpush.bf16.msra.mxu2 %v2303_v8  ;;  %v2394_v7 = vor.u32 %v2561_v63, %v2391_v5 }
  0xbb   :  { %v3090_v17 = vpop.f32.mrf.mxu2  ;;  %v3092_v19 = vpop.f32.mrf.mxu3  ;;  %1284 = vmatpush.bf16.msra.mxu0 %v2235_v14  ;;  %v2330_v14 = vor.u32 %v2553_v10, %v2329_v9  ;;  %v2413_v9 = vld [vmem:[#allocation14 + $0x90] sm:$0xf]  ;;  %v2571_v10 = vld [vmem:[#allocation14 + $0xc8] sm:$0xf0] }
  0xbc   :  { %v424_v20 = vpop.f32.mrf.mxu0  ;;  %v437_v21 = vpop.f32.mrf.mxu1 }
  0xbd   :  { %1297 = vmatpush.bf16.msra.mxu1 %v2239_v15  ;;  %1323 = vmatpush.bf16.msra.mxu3 %v2247_v16  ;;  %v2331_v15 = vld [vmem:[#allocation14 + $0x3c] sm:$0xf0]  ;;  %v2569_v21 = vld [vmem:[#allocation14 + $0xb8] sm:$0xf0] }
  0xbe   :  { %1310 = vmatpush.bf16.msra.mxu2 %v2243_v18  ;;  %v2334_v18 = vor.u32 %v2546_v11, %v2331_v15  ;;  %v2397_v20 = vld [vmem:[#allocation14 + $0x80] sm:$0xf]  ;;  %v2414_v11 = vor.u32 %v2571_v10, %v2413_v9 }
  0xbf   :  { %v2398_v22 = vor.u32 %v2569_v21, %v2397_v20 }
  0xc3   :  { %v450_v23 = vpop.f32.mrf.mxu2  ;;  %v463_v24 = vpop.f32.mrf.mxu3 }
  0xc4   :  { %v3094_v25 = vpop.f32.mrf.mxu0  ;;  %v3096_v27 = vpop.f32.mrf.mxu1  ;;  %v2399_v23 = vld [vmem:[#allocation14 + $0xbc] sm:$0xf0] }
  0xc5   :  { %v2402_v24 = vor.u32 %v2562_v26, %v2399_v23  ;;  %v2556_v26 = vld [vmem:[#allocation14 + $0x50] sm:$0xf0] }
  0xc6   :  { %2318 = vmatmul.msk.bf16.vlgmr.msrb.gmra.mxu0 %vm409_vm0, %v3068_v37 }
  0xc7   :  { %2319 = vmatmul.msk.bf16.vlgmr.msrb.gmra.mxu1 %vm409_vm0, %v3068_v37  ;;  %1335 = vmatpush.bf16.msrb.mxu0 %v2311_v28 }
  0xc8   :  { %2320 = vmatmul.msk.bf16.vlgmr.msrb.gmra.mxu2 %vm409_vm0, %v3068_v37  ;;  %2321 = vmatmul.msk.bf16.vlgmr.msrb.gmra.mxu3 %vm409_vm0, %v3068_v37 }
  0xc9   :  { %1643 = vmatpush.bf16.xpose.msrb.mxu2 %v2394_v7  ;;  %1656 = vmatpush.bf16.xpose.msrb.mxu3 %v2398_v22  ;;  %v2353_v22 = vld [vmem:[#allocation14 + $0x18] sm:$0xf] }
  0xca   :  { %v2354_v23 = vor.u32 %v2556_v26, %v2353_v22  ;;  %v2361_v26 = vld [vmem:[#allocation14 + $0x20] sm:$0xf] }
  0xcb   :  { %v3106_v32 = vpop.f32.mrf.mxu2  ;;  %v3108_v33 = vpop.f32.mrf.mxu3  ;;  %1336 = vmatpush.bf16.msrb.mxu0 %v2251_v31  ;;  %v2563_v31 = vld [vmem:[#allocation14 + $0x8c] sm:$0xf] }
  0xcc   :  { %v476_v34 = vpop.f32.mrf.mxu0  ;;  %v489_v35 = vpop.f32.mrf.mxu1 }
  0xd1   :  { %1644 = vmatpush.bf16.xpose.msrb.mxu2 %v2334_v18 }
  0xd3   :  { %v502_v36 = vpop.f32.mrf.mxu2  ;;  %v515_v38 = vpop.f32.mrf.mxu3 }
  0xd4   :  { %v3110_v39 = vpop.f32.mrf.mxu0  ;;  %v3112_v40 = vpop.f32.mrf.mxu1  ;;  %v2406_v36 = vor.u32 %v2570_v30, %v2405_v29  ;;  %v2407_v38 = vld [vmem:[#allocation14 + $0xc4] sm:$0xf0]  ;;  %v3164_v29 = vld [vmem:[#allocation13] sm:$0xff] }
  0xd5   :  { %v1363_v10 = vperm.slane %v3164_v29, 2 }
  0xd6   :  { %2322 = vmatmul.msk.bf16.vlgmr.msra.gmra.mxu0 %vm409_vm0, %v3068_v37 }
  0xd7   :  { %2323 = vmatmul.msk.bf16.vlgmr.msra.gmra.mxu1 %vm409_vm0, %v3068_v37  ;;  %1669 = vmatpush.bf16.xpose.msra.mxu0 %v2402_v24  ;;  %v2549_v24 = vld [vmem:[#allocation14 + $0x1c] sm:$0xf] }
  0xd8   :  { %2324 = vmatmul.msk.bf16.vlgmr.msra.gmra.mxu2 %vm409_vm0, %v3068_v37  ;;  %2325 = vmatmul.msk.bf16.vlgmr.msra.gmra.mxu3 %vm409_vm0, %v3068_v37 }
  0xdb   :  { %v3122_v41 = vpop.f32.mrf.mxu2  ;;  %v3124_v42 = vpop.f32.mrf.mxu3 }
  0xdc   :  { %v528_v43 = vpop.f32.mrf.mxu0  ;;  %v541_v44 = vpop.f32.mrf.mxu1 }
  0xdd   :  { %v2410_v44 = vor.u32 %v2563_v31, %v2407_v38 }
  0xdf   :  { %1695 = vmatpush.bf16.xpose.msra.mxu2 %v2410_v44  ;;  %v1362_v44 = vperm.slane %v3164_v29, 1 }
  0xe3   :  { %v554_v45 = vpop.f32.mrf.mxu2  ;;  %v567_v46 = vpop.f32.mrf.mxu3 }
  0xe4   :  { %v3126_v47 = vpop.f32.mrf.mxu0  ;;  %v3128_v48 = vpop.f32.mrf.mxu1  ;;  %v2337_v45 = vld [vmem:[#allocation14 + $0x8] sm:$0xf]  ;;  %v2554_v46 = vld [vmem:[#allocation14 + $0x40] sm:$0xf0] }
  0xe6   :  { %2326 = vmatmul.msk.bf16.vlgmr.msrb.gmra.mxu0 %vm409_vm0, %v3068_v37  ;;  %v2389_v37 = vld [vmem:[#allocation14 + $0x78] sm:$0xf] }
  0xe7   :  { %v2390_v3 = vor.u32 %v2568_v62, %v2389_v37  ;;  %v2548_v37 = vld [vmem:[#allocation14 + $0x14] sm:$0xf] }
  0xe9   :  { %1630 = vmatpush.bf16.xpose.msrb.mxu1 %v2390_v3  ;;  %v2347_v3 = vld [vmem:[#allocation14 + $0x4c] sm:$0xf0] }
  0xea   :  { %v2350_v7 = vor.u32 %v2548_v37, %v2347_v3 }
  0xeb   :  { %v3132_v49 = vpop.f32.mrf.mxu2  ;;  %v3134_v50 = vpop.f32.mrf.mxu3 }
  0xec   :  { %v580_v51 = vpop.f32.mrf.mxu0  ;;  %v593_v52 = vpop.f32.mrf.mxu1  ;;  %1696 = vmatpush.bf16.xpose.msra.mxu2 %v2350_v7  ;;  %v773_v31 = vadd.f32 %v3134_v50, %v3078_v61 }
  0xed   :  { %v2338_v51 = vor.u32 %v2554_v46, %v2337_v45  ;;  %v2547_v52 = vld [vmem:[#allocation14 + $0xc] sm:$0xf] }
  0xef   :  { %1657 = vmatpush.bf16.xpose.msrb.mxu3 %v2338_v51 }
  0xf1   :  { %1631 = vmatpush.bf16.xpose.msrb.mxu1 %v2330_v14  ;;  %v2415_v14 = vld [vmem:[#allocation14 + $0xcc] sm:$0xf0] }
  0xf3   :  { %v606_v53 = vpop.f32.mrf.mxu2  ;;  %v774_v54 = vpop.f32.mrf.mxu3 }
  0xf4   :  { %v3136_v55 = vpop.f32.mrf.mxu0  ;;  %v3138_v4 = vpop.f32.mrf.mxu1  ;;  %v2339_v53 = vld [vmem:[#allocation14 + $0x44] sm:$0xf0] }
  0xf5   :  { %v2342_v54 = vor.u32 %v2547_v52, %v2339_v53 }
  0xf7   :  { %1670 = vmatpush.bf16.xpose.msra.mxu0 %v2342_v54  ;;  %1708 = vmatpush.bf16.xpose.msra.mxu3 %v2414_v11 }
  0xf9   :  { %1682 = vmatpush.bf16.xpose.msra.mxu1 %v2406_v36  ;;  %v786_v36 = vadd.f32 %v3136_v55, %v3080_v0  ;;  %v799_v0 = vadd.f32 %v3138_v4, %v3090_v17  ;;  %v2557_v17 = vld [vmem:[#allocation14 + $0x58] sm:$0xf0] }
  0xfb   :  { %v3140_v56 = vpop.f32.mrf.mxu2  ;;  %v3142_v57 = vpop.f32.mrf.mxu3 }
  0xfc   :  { %v787_v58 = vpop.f32.mrf.mxu0  ;;  %v800_v59 = vpop.f32.mrf.mxu1  ;;  %v812_v11 = vadd.f32 %v3140_v56, %v3092_v19  ;;  %v2566_v19 = vld [vmem:[#allocation14 + $0xa4] sm:$0xf]  ;;  %v2431_v56 = vld [vmem:[#allocation14 + $0xdc] sm:$0xf0] }
  0xfd   :  { %v2345_v59 = vld [vmem:[#allocation14 + $0x10] sm:$0xf] }
  0xff   :  { %1709 = vmatpush.bf16.xpose.msra.mxu3 %v2354_v23  ;;  %v2550_v23 = vld [vmem:[#allocation14 + $0x24] sm:$0xf] }
 0x103   :  { %v813_v60 = vpop.f32.mrf.mxu2  ;;  %v826_v1 = vpop.f32.mrf.mxu3 }
 0x104   :  { %v3144_v2 = vpop.f32.mrf.mxu0  ;;  %v3146_v6 = vpop.f32.mrf.mxu1  ;;  %v2555_v60 = vld [vmem:[#allocation14 + $0x48] sm:$0xf0] }
 0x105   :  { %v2346_v1 = vor.u32 %v2555_v60, %v2345_v59  ;;  %v2421_v59 = vld [vmem:[#allocation14 + $0x98] sm:$0xf]  ;;  %v2572_v60 = vld [vmem:[#allocation14 + $0xd0] sm:$0xf0] }
 0x106   :  { %v2422_v3 = vor.u32 %v2572_v60, %v2421_v59  ;;  %v2434_v60 = vor.u32 %v2566_v19, %v2431_v56 }
 0x107   :  { %1683 = vmatpush.bf16.xpose.msra.mxu1 %v2346_v1  ;;  %v2423_v1 = vld [vmem:[#allocation14 + $0xd4] sm:$0xf0] }
 0x10b   :  { %v3148_v8 = vpop.f32.mrf.mxu2  ;;  %v3150_v12 = vpop.f32.mrf.mxu3 }
 0x10c   :  { %v839_v13 = vpop.f32.mrf.mxu0  ;;  %v852_v16 = vpop.f32.mrf.mxu1 }
 0x10d   :  { %v2564_v13 = vld [vmem:[#allocation14 + $0x94] sm:$0xf] }
 0x10e   :  { %v2418_v15 = vor.u32 %v2564_v13, %v2415_v14 }
 0x110   :  { %1721 = vmatpush.bf16.xpose.msrb.mxu0 %v2418_v15  ;;  %v1364_v15 = vperm.slane %v3164_v29, 3 }
 0x113   :  { %v865_v28 = vpop.f32.mrf.mxu2  ;;  %v878_v34 = vpop.f32.mrf.mxu3 }
 0x114   :  { %v3152_v35 = vpop.f32.mrf.mxu0  ;;  %v3154_v43 = vpop.f32.mrf.mxu1  ;;  %v2355_v28 = vld [vmem:[#allocation14 + $0x54] sm:$0xf0]  ;;  %v1361_v34 = vperm.slane %v3164_v29, 0 }
 0x115   :  { %v2358_v30 = vor.u32 %v2549_v24, %v2355_v28  ;;  %v2363_v24 = vld [vmem:[#allocation14 + $0x5c] sm:$0xf0] }
 0x116   :  { %v2429_v28 = vld [vmem:[#allocation14 + $0xa0] sm:$0xf] }
 0x118   :  { %1722 = vmatpush.bf16.xpose.msrb.mxu0 %v2358_v30 }
 0x11b   :  { %v3156_v58 = vpop.f32.mrf.mxu2  ;;  %v3158_v62 = vpop.f32.mrf.mxu3 }
 0x11c   :  { %v891_v63 = vpop.f32.mrf.mxu0  ;;  %v904_v5 = vpop.f32.mrf.mxu1 }
 0x11d   :  { %v2565_v63 = vld [vmem:[#allocation14 + $0x9c] sm:$0xf] }
 0x11e   :  { %v2426_v7 = vor.u32 %v2565_v63, %v2423_v1 }
 0x123   :  { %v917_v16 = vpop.f32.mrf.mxu2  ;;  %v930_v18 = vpop.f32.mrf.mxu3 }
 0x124   :  { %v3160_v20 = vpop.f32.mrf.mxu0  ;;  %v3162_v21 = vpop.f32.mrf.mxu1 }
 0x12b   :  { %v1156_v38 = vpop.f32.mrf.mxu2  ;;  %v1169_v46 = vpop.f32.mrf.mxu3 }
 0x12c   :  { %v1342_v45 = vadd.f32 %v1156_v38, %v773_v31  ;;  %v943_v51 = vpop.f32.mrf.mxu0  ;;  %v1343_v52 = vadd.f32 %v1169_v46, %v786_v36  ;;  %v956_v53 = vpop.f32.mrf.mxu1  ;;  %v2573_v31 = vld [vmem:[#allocation14 + $0xd8] sm:$0xf0]  ;;  %v2362_v38 = vor.u32 %v2557_v17, %v2361_v26  ;;  %v1365_v46 = vperm.slane %v3164_v29, 4 }
 0x12d   :  { %v2366_v51 = vor.u32 %v2550_v23, %v2363_v24  ;;  %v2430_v59 = vor.u32 %v2573_v31, %v2429_v28  ;;  %v1367_v17 = vperm.slane %v3164_v29, 6  ;;  %v864_v24 = vadd.f32 %v3148_v8, %v3108_v33  ;;  %v2379_v33 = vld [vmem:[#allocation14 + $0x6c] sm:$0xf0] }
 0x12e   :  { %v1391_v54 = vadd.f32 %v1361_v34, %v1342_v45  ;;  %v1392_v37 = vadd.f32 %v1362_v44, %v1343_v52  ;;  %v825_v34 = vadd.f32 %v3142_v57, %v3094_v25  ;;  %v838_v44 = vadd.f32 %v3144_v2, %v3096_v27  ;;  %v2437_v27 = vld [vmem:[#allocation14 + $0xa8] sm:$0xf]  ;;  %v2574_v2 = vld [vmem:[#allocation14 + $0xe0] sm:$0xf0] }
 0x12f   :  { %v1368_v31 = vperm.slane %v3164_v29, 7 }
 0x130   :  { %v1406_v61 = vmax.f32 %v1391_v54, 0.0  ;;  %v1407_v50 = vmax.f32 %v1392_v37, 0.0  ;;  %v1366_v54 = vperm.slane %v3164_v29, 5 }
 0x132   :  { %v1421_v5 = vpack.c.bf16 %v1406_v61, %v1406_v61  ;;  %v1422_v55 = vpack.c.bf16 %v1407_v50, %v1407_v50 }
 0x133   :  { %v1158_v9 = vpop.f32.mrf.mxu2  ;;  %v1171_v13 = vpop.f32.mrf.mxu3 }
 0x134   :  { %1632 = vmatmul.bf16.vlgmr.msrb.gmra.mxu1 %v1421_v5  ;;  %v1182_v14 = vpop.f32.mrf.mxu0  ;;  %1645 = vmatmul.bf16.vlgmr.msrb.gmra.mxu2 %v1422_v55  ;;  %v1195_v18 = vpop.f32.mrf.mxu1  ;;  %v2558_v55 = vld [vmem:[#allocation14 + $0x60] sm:$0xf0] }
 0x135   :  { %v1344_v16 = vadd.f32 %v1182_v14, %v799_v0  ;;  %1734 = vmatpush.bf16.xpose.msrb.mxu1 %v2422_v3  ;;  %v1345_v22 = vadd.f32 %v1195_v18, %v812_v11  ;;  %1747 = vmatpush.bf16.xpose.msrb.mxu2 %v2426_v7  ;;  %v2567_v3 = vld [vmem:[#allocation14 + $0xac] sm:$0xf]  ;;  %v2439_v7 = vld [vmem:[#allocation14 + $0xe4] sm:$0xf0]  ;;  %v2438_v14 = vor.u32 %v2574_v2, %v2437_v27 }
 0x136   :  { %v2369_v0 = vld [vmem:[#allocation14 + $0x28] sm:$0xf]  ;;  %v2442_v18 = vor.u32 %v2567_v3, %v2439_v7 }
 0x137   :  { %v1393_v4 = vadd.f32 %v1363_v10, %v1344_v16  ;;  %v1394_v30 = vadd.f32 %v1364_v15, %v1345_v22  ;;  %v2551_v10 = vld [vmem:[#allocation14 + $0x2c] sm:$0xf]  ;;  %v2371_v11 = vld [vmem:[#allocation14 + $0x64] sm:$0xf0]  ;;  %v851_v15 = vadd.f32 %v3146_v6, %v3106_v32  ;;  %v2377_v6 = vld [vmem:[#allocation14 + $0x30] sm:$0xf] }
 0x138   :  { %v2374_v23 = vor.u32 %v2551_v10, %v2371_v11 }
 0x139   :  { %v1408_v36 = vmax.f32 %v1393_v4, 0.0  ;;  %v1409_v45 = vmax.f32 %v1394_v30, 0.0  ;;  %v2370_v4 = vor.u32 %v2558_v55, %v2369_v0  ;;  %v903_v55 = vadd.f32 %v3154_v43, %v3122_v41 }
 0x13b   :  { %v1423_v52 = vpack.c.bf16 %v1408_v36, %v1408_v36  ;;  %v1208_v53 = vpop.f32.mrf.mxu2  ;;  %v1424_v37 = vpack.c.bf16 %v1409_v45, %v1409_v45  ;;  %v1221_v1 = vpop.f32.mrf.mxu3  ;;  %v2445_v45 = vld [vmem:[#allocation14 + $0xb0] sm:$0xf] }
 0x13c   :  { %v1346_v63 = vadd.f32 %v1208_v53, %v825_v34  ;;  %v1184_v61 = vpop.f32.mrf.mxu0  ;;  %v1347_v25 = vadd.f32 %v1221_v1, %v838_v44  ;;  %v1197_v57 = vpop.f32.mrf.mxu1  ;;  %v2559_v34 = vld [vmem:[#allocation14 + $0x68] sm:$0xf0]  ;;  %v2552_v44 = vld [vmem:[#allocation14 + $0x34] sm:$0xf] }
 0x13d   :  { %1658 = vmatmul.bf16.vlgmr.msrb.gmra.mxu3 %v1423_v52  ;;  %1735 = vmatpush.bf16.xpose.msrb.mxu1 %v2362_v38  ;;  %v3190_v38 = vld [vmem:[#allocation13 + $0x8] sm:$0xff]  ;;  %v2378_v29 = vor.u32 %v2559_v34, %v2377_v6  ;;  %v877_v52 = vadd.f32 %v3150_v12, %v3110_v39 }
 0x13e   :  { %v1395_v50 = vadd.f32 %v1365_v46, %v1346_v63  ;;  %1671 = vmatmul.bf16.vlgmr.msra.gmra.mxu0 %v1424_v37  ;;  %1748 = vmatpush.bf16.xpose.msrb.mxu2 %v2366_v51  ;;  %v1396_v5 = vadd.f32 %v1366_v54, %v1347_v25  ;;  %v2575_v46 = vld [vmem:[#allocation14 + $0xe8] sm:$0xf0]  ;;  %v1369_v54 = vperm.slane %v3190_v38, 0  ;;  %v1370_v1 = vperm.slane %v3190_v38, 1 }
 0x13f   :  { %1760 = vmatpush.bf16.xpose.msrb.mxu3 %v2430_v59  ;;  %1773 = vmatpush.bf16.xpose.msra.mxu0 %v2434_v60  ;;  %v2382_v59 = vor.u32 %v2552_v44, %v2379_v33  ;;  %v890_v60 = vadd.f32 %v3152_v35, %v3112_v40  ;;  %v2446_v61 = vor.u32 %v2575_v46, %v2445_v45  ;;  %v2385_v40 = vld [vmem:[#allocation14 + $0x38] sm:$0xf]  ;;  %v2560_v35 = vld [vmem:[#allocation14 + $0x70] sm:$0xf0]  ;;  %v1371_v11 = vperm.slane %v3190_v38, 2 }
 0x140   :  { %v1410_v9 = vmax.f32 %v1395_v50, 0.0  ;;  %v1411_v13 = vmax.f32 %v1396_v5, 0.0  ;;  %v1375_v45 = vperm.slane %v3190_v38, 6 }
 0x142   :  { %v1425_v16 = vpack.c.bf16 %v1410_v9, %v1410_v9  ;;  %v1426_v22 = vpack.c.bf16 %v1411_v13, %v1411_v13  ;;  %v2386_v13 = vor.u32 %v2560_v35, %v2385_v40 }
 0x143   :  { %v1210_v26 = vpop.f32.mrf.mxu2  ;;  %v1223_v28 = vpop.f32.mrf.mxu3 }
 0x144   :  { %1684 = vmatmul.bf16.vlgmr.msra.gmra.mxu1 %v1425_v16  ;;  %v1234_v30 = vpop.f32.mrf.mxu0  ;;  %1697 = vmatmul.bf16.vlgmr.msra.gmra.mxu2 %v1426_v22  ;;  %v1247_v56 = vpop.f32.mrf.mxu1  ;;  %v1373_v28 = vperm.slane %v3190_v38, 4 }
 0x145   :  { %v1348_v19 = vadd.f32 %v1234_v30, %v851_v15  ;;  %1786 = vmatpush.bf16.xpose.msra.mxu1 %v2438_v14  ;;  %v1349_v32 = vadd.f32 %v1247_v56, %v864_v24  ;;  %v916_v14 = vadd.f32 %v3156_v58, %v3124_v42  ;;  %v942_v42 = vadd.f32 %v3160_v20, %v3128_v48 }
 0x146   :  { %1799 = vmatpush.bf16.xpose.msra.mxu2 %v2442_v18  ;;  %v1372_v18 = vperm.slane %v3190_v38, 3  ;;  %v955_v48 = vadd.f32 %v3162_v21, %v3132_v49 }
 0x147   :  { %v1397_v36 = vadd.f32 %v1367_v17, %v1348_v19  ;;  %1761 = vmatpush.bf16.xpose.msrb.mxu3 %v2370_v4  ;;  %1774 = vmatpush.bf16.xpose.msra.mxu0 %v2374_v23  ;;  %v1398_v8 = vadd.f32 %v1368_v31, %v1349_v32  ;;  %v929_v23 = vadd.f32 %v3158_v62, %v3126_v47  ;;  %v1374_v31 = vperm.slane %v3190_v38, 5 }
 0x149   :  { %v1412_v51 = vmax.f32 %v1397_v36, 0.0  ;;  %v1413_v53 = vmax.f32 %v1398_v8, 0.0 }
 0x14b   :  { %v1427_v37 = vpack.c.bf16 %v1412_v51, %v1412_v51  ;;  %v1260_v63 = vpop.f32.mrf.mxu2  ;;  %v1428_v25 = vpack.c.bf16 %v1413_v53, %v1413_v53  ;;  %v1273_v50 = vpop.f32.mrf.mxu3 }
 0x14c   :  { %v1350_v57 = vadd.f32 %v1260_v63, %v877_v52  ;;  %v1236_v27 = vpop.f32.mrf.mxu0  ;;  %v1351_v2 = vadd.f32 %v1273_v50, %v890_v60  ;;  %v1249_v3 = vpop.f32.mrf.mxu1 }
 0x14d   :  { %1710 = vmatmul.bf16.vlgmr.msra.gmra.mxu3 %v1427_v37  ;;  %1787 = vmatpush.bf16.xpose.msra.mxu1 %v2378_v29 }
 0x14e   :  { %v1399_v39 = vadd.f32 %v1369_v54, %v1350_v57  ;;  %1723 = vmatmul.bf16.vlgmr.msrb.gmra.mxu0 %v1428_v25  ;;  %1800 = vmatpush.bf16.xpose.msra.mxu2 %v2382_v59  ;;  %v1400_v12 = vadd.f32 %v1370_v1, %v1351_v2  ;;  %v2594_v25 = vld [vmem:[#allocation16] ss:$0 sm:$0xff] }
 0x14f   :  { %1812 = vmatpush.bf16.xpose.msra.mxu3 %v2446_v61 }
 0x150   :  { %v1414_v5 = vmax.f32 %v1399_v39, 0.0  ;;  %v1415_v7 = vmax.f32 %v1400_v12, 0.0 }
 0x152   :  { %v1429_v0 = vpack.c.bf16 %v1414_v5, %v1414_v5  ;;  %v1430_v9 = vpack.c.bf16 %v1415_v7, %v1415_v7  ;;  %v2577_v5 = vld [vmem:[#allocation17 + $0x8] sm:$0xff] }
 0x153   :  { %v1262_v10 = vpop.f32.mrf.mxu2  ;;  %v1275_v15 = vpop.f32.mrf.mxu3  ;;  %1850 = vmatpush.bf16.msrb.mxu0 %v2577_v5 }
 0x154   :  { %1736 = vmatmul.bf16.vlgmr.msrb.gmra.mxu1 %v1429_v0  ;;  %v1286_v16 = vpop.f32.mrf.mxu0  ;;  %1749 = vmatmul.bf16.vlgmr.msrb.gmra.mxu2 %v1430_v9  ;;  %v1299_v26 = vpop.f32.mrf.mxu1  ;;  %v2576_v9 = vld [vmem:[#allocation17] sm:$0xff] }
 0x155   :  { %v1352_v22 = vadd.f32 %v1286_v16, %v903_v55  ;;  %v1353_v17 = vadd.f32 %v1299_v26, %v916_v14 }
 0x157   :  { %v1401_v4 = vadd.f32 %v1371_v11, %v1352_v22  ;;  %1813 = vmatpush.bf16.xpose.msra.mxu3 %v2386_v13  ;;  %v1402_v41 = vadd.f32 %v1372_v18, %v1353_v17  ;;  %1851 = vmatpush.bf16.msrb.mxu0 %v2576_v9 }
 0x159   :  { %v1416_v43 = vmax.f32 %v1401_v4, 0.0  ;;  %v1417_v24 = vmax.f32 %v1402_v41, 0.0 }
 0x15b   :  { %v1431_v58 = vpack.c.bf16 %v1416_v43, %v1416_v43  ;;  %v1312_v30 = vpop.f32.mrf.mxu2  ;;  %v1432_v19 = vpack.c.bf16 %v1417_v24, %v1417_v24  ;;  %v1325_v32 = vpop.f32.mrf.mxu3 }
 0x15c   :  { %v1354_v56 = vadd.f32 %v1312_v30, %v929_v23  ;;  %v1288_v6 = vpop.f32.mrf.mxu0  ;;  %v1355_v34 = vadd.f32 %v1325_v32, %v942_v42  ;;  %v1301_v36 = vpop.f32.mrf.mxu1 }
 0x15d   :  { %1762 = vmatmul.bf16.vlgmr.msrb.gmra.mxu3 %v1431_v58 }
 0x15e   :  { %v1403_v44 = vadd.f32 %v1373_v28, %v1354_v56  ;;  %1775 = vmatmul.bf16.vlgmr.msra.gmra.mxu0 %v1432_v19  ;;  %v1404_v47 = vadd.f32 %v1374_v31, %v1355_v34 }
 0x160   :  { %v1418_v62 = vmax.f32 %v1403_v44, 0.0  ;;  %v1419_v33 = vmax.f32 %v1404_v47, 0.0 }
 0x162   :  { %v1433_v8 = vpack.c.bf16 %v1418_v62, %v1418_v62  ;;  %v1434_v20 = vpack.c.bf16 %v1419_v33, %v1419_v33  ;;  %v2595_v62 = vld [vmem:[%s3231_s11] ss:$0 sm:$0xff]  ;;  %s2897_s11 = smov [#allocation19]  }
 0x163   :  { %v1314_v46 = vpop.f32.mrf.mxu2  ;;  %v1327_v51 = vpop.f32.mrf.mxu3  ;;  %s1905_s28 = sshll.u32 %s2897_s11, 4  ;;  %s1906_s28 = int_to_ptr.vmem [resolvable:$true] %s1905_s28 }
 0x164   :  { %1788 = vmatmul.bf16.vlgmr.msra.gmra.mxu1 %v1433_v8  ;;  %v1338_v29 = vpop.f32.mrf.mxu0  ;;  %1801 = vmatmul.bf16.vlgmr.msra.gmra.mxu2 %v1434_v20 }
 0x165   :  { %v1356_v52 = vadd.f32 %v1338_v29, %v955_v48 }
 0x167   :  { %v1405_v53 = vadd.f32 %v1375_v45, %v1356_v52 }
 0x169   :  { %v1420_v54 = vmax.f32 %v1405_v53, 0.0  ;;  %v1876_v53 = vld [vmem:[#allocation7] sm:$0xff] }
 0x16a   :  { %vm1877_vm2 = vcmp.ne.f32.partialorder %v1876_v53, 0.0 }
 0x16b   :  { %v1435_v59 = vpack.c.bf16 %v1420_v54, %v1420_v54 }
 0x16c   :  { %v1340_v60 = vpop.f32.mrf.mxu0 }
 0x16d   :  { %1814 = vmatmul.bf16.vlgmr.msra.gmra.mxu3 %v1435_v59 }
 0x1b1   :  { %v1633_v37 = vpop.f32.mrf.mxu1 }
 0x1b2   :  { %v1634_v38 = vadd.f32 %v2594_v25, %v1633_v37 }
 0x1b7   :  { %v1646_v63 = vpop.f32.mrf.mxu2 }
 0x1b8   :  { %v1647_v27 = vadd.f32 %v1646_v63, %v1634_v38 }
 0x1b9   :  { %v1635_v1 = vpop.f32.mrf.mxu1 }
 0x1bb   :  { %v1672_v61 = vpop.f32.mrf.mxu0 }
 0x1bf   :  { %v1648_v49 = vpop.f32.mrf.mxu2 }
 0x1c0   :  { %v1659_v21 = vpop.f32.mrf.mxu3 }
 0x1c1   :  { %v1685_v57 = vpop.f32.mrf.mxu1  ;;  %v1660_v2 = vadd.f32 %v1659_v21, %v1647_v27 }
 0x1c3   :  { %v1674_v50 = vpop.f32.mrf.mxu0  ;;  %v1673_v40 = vadd.f32 %v1672_v61, %v1660_v2  ;;  %v2896_v61 = vmov -50.0  }
 0x1c4   :  { %v1878_v25 = vsel %vm1877_vm2, 1.0, %v2896_v61 }
 0x1c5   :  { %v1686_v7 = vadd.f32 %v1685_v57, %v1673_v40 }
 0x1c7   :  { %v1698_v3 = vpop.f32.mrf.mxu2 }
 0x1c8   :  { %v1661_v39 = vpop.f32.mrf.mxu3  ;;  %v1699_v11 = vadd.f32 %v1698_v3, %v1686_v7 }
 0x1c9   :  { %v1687_v12 = vpop.f32.mrf.mxu1 }
 0x1cb   :  { %v1724_v35 = vpop.f32.mrf.mxu0 }
 0x1cf   :  { %v1700_v0 = vpop.f32.mrf.mxu2 }
 0x1d0   :  { %v1711_v55 = vpop.f32.mrf.mxu3 }
 0x1d1   :  { %v1737_v10 = vpop.f32.mrf.mxu1  ;;  %v1712_v14 = vadd.f32 %v1711_v55, %v1699_v11 }
 0x1d3   :  { %v1726_v13 = vpop.f32.mrf.mxu0  ;;  %v1725_v18 = vadd.f32 %v1724_v35, %v1712_v14 }
 0x1d5   :  { %v1738_v17 = vadd.f32 %v1737_v10, %v1725_v18 }
 0x1d7   :  { %v1750_v15 = vpop.f32.mrf.mxu2 }
 0x1d8   :  { %v1713_v16 = vpop.f32.mrf.mxu3  ;;  %v1751_v43 = vadd.f32 %v1750_v15, %v1738_v17 }
 0x1d9   :  { %v1739_v22 = vpop.f32.mrf.mxu1 }
 0x1db   :  { %v1776_v26 = vpop.f32.mrf.mxu0 }
 0x1df   :  { %v1752_v4 = vpop.f32.mrf.mxu2 }
 0x1e0   :  { %v1763_v41 = vpop.f32.mrf.mxu3 }
 0x1e1   :  { %v1789_v23 = vpop.f32.mrf.mxu1  ;;  %v1764_v24 = vadd.f32 %v1763_v41, %v1751_v43 }
 0x1e3   :  { %v1778_v28 = vpop.f32.mrf.mxu0  ;;  %v1777_v42 = vadd.f32 %v1776_v26, %v1764_v24 }
 0x1e5   :  { %v1790_v19 = vadd.f32 %v1789_v23, %v1777_v42 }
 0x1e7   :  { %v1802_v58 = vpop.f32.mrf.mxu2 }
 0x1e8   :  { %v1765_v30 = vpop.f32.mrf.mxu3  ;;  %v1803_v56 = vadd.f32 %v1802_v58, %v1790_v19 }
 0x1e9   :  { %v1791_v31 = vpop.f32.mrf.mxu1 }
 0x1ef   :  { %v1804_v32 = vpop.f32.mrf.mxu2 }
 0x1f0   :  { %v1815_v6 = vpop.f32.mrf.mxu3 }
 0x1f1   :  { %v1816_v34 = vadd.f32 %v1815_v6, %v1803_v56 }
 0x1f3   :  { %v1819_v36 = vmax.f32 %v1816_v34, 0.0 }
 0x1f5   :  { %v1820_v44 = vpack.c.bf16 %v1819_v36, %v1819_v36 }
 0x1f7   :  { %2455 = vmatmul.msk.bf16.vlgmr.msrb.gmra.mxu0 %vm409_vm0, %v1820_v44 }
 0x1f8   :  { %v1817_v47 = vpop.f32.mrf.mxu3 }
 0x274   :  { %v1853_v33 = vpop.f32.mrf.mxu0 }
 0x275   :  { %v1854_v8 = vadd.f32 %v2595_v62, %v1853_v33 }
 0x277   :  { %v1857_v48 = vsub.f32 0.0, %v1854_v8 }
 0x279   :  { %v1858_v20 = vmul.f32 1.442695, %v1857_v48 }
 0x27b   :  { %2596 = vpow2.f32 %v1858_v20 }
 0x27c   :  { %v1855_v45 = vpop.f32.mrf.mxu0 }
 0x281   :  { %v2597_v46 = vpop.eup %2596 }
 0x282   :  { %v1860_v51 = vadd.f32 1.0, %v2597_v46 }
 0x284   :  { %2598 = vrcp.f32 %v1860_v51  ;;  %v1872_v59 = vand.u32 2147483648, %v1860_v51  ;;  %v1870_v37 = vand.u32 2147483647, %v1860_v51  ;;  %vm1866_vm3 = vweird.f32 %v1860_v51 }
 0x286   :  { %v1873_v1 = vor.u32 1.1754944e-38, %v1872_v59  ;;  %vm1871_vm5 = vcmp.eq.f32.partialorder %v1870_v37, 8.507059e+37 }
 0x28a   :  { %v2599_v29 = vpop.eup %2598 }
 0x28b   :  { %v1862_v52 = vmul.f32 %v2599_v29, %v1860_v51  ;;  %vm1867_vm1 = vweird.f32 %v2599_v29 }
 0x28c   :  { %vm1868_vm4 = vmor %vm1866_vm3, %vm1867_vm1 }
 0x28d   :  { %v1863_v54 = vsub.f32 1.0, %v1862_v52 }
 0x28f   :  { %v1864_v60 = vmul.f32 %v2599_v29, %v1863_v54 }
 0x291   :  { %v1865_v63 = vadd.f32 %v2599_v29, %v1864_v60 }
 0x293   :  { %v1869_v49 = vsel %vm1868_vm4, %v2599_v29, %v1865_v63 }
 0x294   :  { %v1874_v21 = vsel %vm1871_vm5, %v1873_v1, %v1869_v49 }
 0x295   :  { %v1879_v57 = vadd.f32 %v1878_v25, %v1874_v21 }
 0x297   :  { %v1880_v38 = vmul.f32 1.442695, %v1879_v57 }
 0x299   :  { %2600 = vpow2.f32 %v1880_v38 }
 0x29f   :  { %v2601_v50 = vpop.eup %2600 }
 0x2a0   :  { %1882 = vadd.xlane.f32.xlu0 %v2601_v50 }
 0x313   :  { %v1883_v27 = vpop.xlane.xlu0 %1882 }
 0x314   :  { %2602 = vrcp.f32 %v1883_v27  ;;  %v1895_v12 = vand.u32 2147483648, %v1883_v27  ;;  %v1893_v40 = vand.u32 2147483647, %v1883_v27  ;;  %vm1889_vm7 = vweird.f32 %v1883_v27 }
 0x316   :  { %v1896_v7 = vor.u32 1.1754944e-38, %v1895_v12  ;;  %vm1894_vm9 = vcmp.eq.f32.partialorder %v1893_v40, 8.507059e+37 }
 0x31a   :  { %v2603_v2 = vpop.eup %2602 }
 0x31b   :  { %v1885_v3 = vmul.f32 %v2603_v2, %v1883_v27  ;;  %vm1890_vm6 = vweird.f32 %v2603_v2 }
 0x31c   :  { %vm1891_vm8 = vmor %vm1889_vm7, %vm1890_vm6 }
 0x31d   :  { %v1886_v39 = vsub.f32 1.0, %v1885_v3 }
 0x31f   :  { %v1887_v5 = vmul.f32 %v2603_v2, %v1886_v39 }
 0x321   :  { %v1888_v35 = vadd.f32 %v2603_v2, %v1887_v5 }
 0x323   :  { %v1892_v0 = vsel %vm1891_vm8, %v2603_v2, %v1888_v35 }
 0x324   :  { %v1897_v55 = vsel %vm1894_vm9, %v1896_v7, %v1892_v0 }
 0x325   :  { %v1898_v9 = vmul.f32 %v2601_v50, %v1897_v55 }
 0x327   :  { %1899 = vst [vmem:[#allocation19] sm:$0xff] %v1898_v9 }
 0x328   :  { %1910 = dma.vmem_to_hbm [thread:$0]  %s1906_s28, 128, %s1908_s1, [#allocation4]  }
 0x329   :  { %2880 = dma.done.wait [#allocation4], 128  }
 0x32a   :  { %2881 = vsyncadd [#allocation4], 4294967168 }
 0x32b   :  { %1915 = vsyncpa [#allocation3], 1 }
 0x32c   :  { %1916 = vsyncpa [#allocation6], 1 }
 0x32d   :  { %1917 = vsyncpa [#allocation9], 1 }
 0x32e   :  { %1918 = vsyncpa [#allocation12], 1 }
 0x32f   :  { %1919 = vsyncpa [#allocation15], 1 }
 0x330   :  { %1920 = vsyncpa [#allocation18], 1 }
 0x331   :  { %1921 = vsyncpa [#allocation4], 1 }

</bundles_post_ra>
